<compile_context>
chip_gen: v6e
topology: v6e:2x2x1
jax: 0.10.0
libtpu: 0.0.40
codegen_flags: <defaults>
</compile_context>

<pallas_src>
import jax
import jax.numpy as jnp
from jax.experimental import pallas as pl
from jax.experimental.pallas import tpu as pltpu


def _round_up(x, m):
    return ((x + m - 1) // m) * m


def _make_kernel(num_classes):
    """Build the fused kernel; num_classes (real, unpadded) is closed over statically."""
    C = int(num_classes)

    def kernel(ids_ref, emb_ref, wih_ref, whh_ref, b_ref, wcls_ref, bcls_ref,
               preds_ref, logits_ref):
        # ids_ref   : (B_pad, T)     int32 token ids (padded rows are 0)
        # emb_ref   : (V_pad, D)     f32 embedding table, row 0 zeroed, rows >= V zero
        # wih_ref   : (D, 4D)        f32 W_ih^T
        # whh_ref   : (D, 4D)        f32 W_hh^T
        # b_ref     : (1, 4D)        f32 b_ih + b_hh
        # wcls_ref  : (D, C_pad)     f32 W_cls^T (lane padded)
        # bcls_ref  : (1, C_pad)     f32 b_cls   (lane padded)
        # preds_ref : (B_pad, 1)     int32 argmax per row
        # logits_ref: (B_pad, C_pad) f32 logits (padded lanes = -inf)
        B_pad, T = ids_ref.shape
        V_pad, D = emb_ref.shape
        C_pad = logits_ref.shape[1]
        H4 = 4 * D
        f32, bf16 = jnp.float32, jnp.bfloat16

        # ---- hoisted work, off the serial critical path ---------------------
        # Fold embedding gather with the input projection:
        #   row v of emb_proj == emb[v] @ W_ih^T, so x_t @ W_ih^T == onehot(ids_t) @ emb_proj.
        emb_proj = jnp.dot(emb_ref[...].astype(bf16), wih_ref[...].astype(bf16),
                           preferred_element_type=f32).astype(bf16)        # (V_pad, 4D)
        whh = whh_ref[...].astype(bf16)                                     # (D, 4D)
        bias = jnp.broadcast_to(b_ref[...], (B_pad, H4))                    # hoisted broadcast

        # sigmoid(x) = 0.5 * tanh(x / 2) + 0.5  ->  one EUP pass over the whole gate block.
        lane4 = jax.lax.broadcasted_iota(jnp.int32, (B_pad, H4), 1)
        is_g = (lane4 >= 2 * D) & (lane4 < 3 * D)          # the "g" (tanh) gate lanes
        pre = jnp.where(is_g, 1.0, 0.5)                    # z scale (x/2 on sigmoid lanes)
        post = jnp.where(is_g, 0.0, 0.5)                   # sigmoid fix-up offset

        ids = ids_ref[...]                                                  # (B_pad, T)
        viota = jax.lax.broadcasted_iota(jnp.int32, (B_pad, V_pad), 1)

        h = jnp.zeros((B_pad, D), f32)
        c = jnp.zeros((B_pad, D), f32)

        # ---- statically unrolled recurrence (T is small) --------------------
        # Gate order matches PyTorch LSTM: i, f, g, o.
        for t in range(T):
            onehot = jnp.where(viota == ids[:, t:t + 1], 1.0, 0.0).astype(bf16)
            zx = jnp.dot(onehot, emb_proj, preferred_element_type=f32)      # gather + x@W_ih^T
            z = zx + jnp.dot(h.astype(bf16), whh, preferred_element_type=f32) + bias
            y = jnp.tanh(z * pre)                    # single EUP pass for all 4 gates
            gates = y * pre + post                   # VPU fix-up: sigmoid lanes 0.5*y+0.5
            i = gates[:, 0:D]
            f = gates[:, D:2 * D]
            g = gates[:, 2 * D:3 * D]
            o = gates[:, 3 * D:4 * D]
            c = f * c + i * g
            h = o * jnp.tanh(c)

        # ---- classifier + in-kernel argmax (last timestep hidden state) -----
        logits = jnp.dot(h, wcls_ref[...], preferred_element_type=f32) + bcls_ref[...]
        lanec = jax.lax.broadcasted_iota(jnp.int32, (B_pad, C_pad), 1)
        masked = jnp.where(lanec < C, logits, -jnp.inf)    # padded lanes must never win
        logits_ref[...] = masked
        mx = jnp.max(masked, axis=1, keepdims=True)
        # first-occurrence argmax via min-index-of-max (f32 reduce for safe lowering)
        first = jnp.min(jnp.where(masked == mx, lanec.astype(f32), jnp.float32(C_pad)),
                        axis=1, keepdims=True)
        preds_ref[...] = first.astype(jnp.int32)

    return kernel


def prepare_params(params):
    """One-time layout prep (padding / transposes) — not on the per-call path."""
    emb = params["embedding"]                  # (V, D), row 0 zeroed (padding_idx=0)
    V, D = emb.shape
    C = params["w_cls_t"].shape[1]
    V_pad = _round_up(max(V, 8), 128)          # lane-dense one-hot operand
    C_pad = _round_up(max(C, 128), 128)        # lane-dense logits output

    emb_p = jnp.zeros((V_pad, D), jnp.float32).at[:V].set(emb)
    wcls_p = jnp.zeros((D, C_pad), jnp.float32).at[:, :C].set(params["w_cls_t"])
    bcls_p = jnp.zeros((1, C_pad), jnp.float32).at[0, :C].set(params["b_cls"])

    return {
        "emb": emb_p,
        "w_ih_t": params["w_ih_t"],            # (D, 4D)
        "w_hh_t": params["w_hh_t"],            # (D, 4D)
        "bias": params["bias"].reshape(1, -1),  # (1, 4D)
        "w_cls": wcls_p,                        # (D, C_pad)
        "b_cls": bcls_p,                        # (1, C_pad)
        "num_classes": C,                       # python int (static)
    }


def make_forward(kp):
    """Returns forward(x_ids) -> (preds (B,), logits (B, C)); preds is the module output."""
    C = int(kp["num_classes"])
    C_pad = kp["w_cls"].shape[1]
    kernel = _make_kernel(C)
    vmem = pl.BlockSpec(memory_space=pltpu.MemorySpace.VMEM)

    @jax.jit
    def _forward(x_ids, emb, wih, whh, bias, wcls, bcls):
        B, T = x_ids.shape
        B_pad = max(8, _round_up(B, 8))
        ids_p = jnp.zeros((B_pad, T), jnp.int32).at[:B, :].set(x_ids.astype(jnp.int32))

        # Single-shot, no grid: every operand fits trivially in VMEM (~100 KB total).
        # For large batches, add a leading batch grid axis with
        # dimension_semantics=("parallel",) so both v7x TensorCores are used.
        preds_p, logits_p = pl.pallas_call(
            kernel,
            out_shape=(jax.ShapeDtypeStruct((B_pad, 1), jnp.int32),
                       jax.ShapeDtypeStruct((B_pad, C_pad), jnp.float32)),
            in_specs=[vmem] * 7,
            out_specs=(vmem, vmem),
        )(ids_p, emb, wih, whh, bias, wcls, bcls)

        return preds_p[:B, 0], logits_p[:B, :C]

    def forward(x_ids):
        return _forward(x_ids, kp["emb"], kp["w_ih_t"], kp["w_hh_t"],
                        kp["bias"], kp["w_cls"], kp["b_cls"])

    return forward


def reference_forward(x_ids, params):
    """Pure-JAX f32 reference of the same math (for correctness checking)."""
    emb = params["embedding"]
    x_emb = emb[x_ids]
    B, T, D = x_emb.shape
    w_ih_t, w_hh_t, bias = params["w_ih_t"], params["w_hh_t"], params["bias"]

    def step(carry, x_t):
        h, c = carry
        z = x_t @ w_ih_t + h @ w_hh_t + bias
        i = jax.nn.sigmoid(z[:, :D])
        f = jax.nn.sigmoid(z[:, D:2 * D])
        g = jnp.tanh(z[:, 2 * D:3 * D])
        o = jax.nn.sigmoid(z[:, 3 * D:])
        c = f * c + i * g
        h = o * jnp.tanh(c)
        return (h, c), None

    (h, _), _ = jax.lax.scan(step,
                             (jnp.zeros((B, D), jnp.float32),
                              jnp.zeros((B, D), jnp.float32)),
                             jnp.swapaxes(x_emb, 0, 1))
    logits = h @ params["w_cls_t"] + params["b_cls"]
    return jnp.argmax(logits, axis=1), logits


def init_params(key, vocab_size, vector_dim, sentence_length):
    D = vector_dim
    C = sentence_length + 1
    ks = jax.random.split(key, 7)
    scale = 1.0 / jnp.sqrt(D)

    embedding = jax.random.normal(ks[0], (vocab_size, D), jnp.float32)
    embedding = embedding.at[0].set(0.0)       # padding_idx=0

    # PyTorch LSTM params: weight_ih (4D, D), weight_hh (4D, D), bias_ih (4D,), bias_hh (4D,)
    w_ih = jax.random.uniform(ks[1], (4 * D, D), jnp.float32, -scale, scale)
    w_hh = jax.random.uniform(ks[2], (4 * D, D), jnp.float32, -scale, scale)
    b_ih = jax.random.uniform(ks[3], (4 * D,), jnp.float32, -scale, scale)
    b_hh = jax.random.uniform(ks[4], (4 * D,), jnp.float32, -scale, scale)

    # Linear: weight (C, D), bias (C,)
    w_cls = jax.random.uniform(ks[5], (C, D), jnp.float32, -scale, scale)
    b_cls = jax.random.uniform(ks[6], (C,), jnp.float32, -scale, scale)

    return {
        "embedding": embedding,
        "w_ih_t": w_ih.T,                      # (D, 4D)
        "w_hh_t": w_hh.T,                      # (D, 4D)
        "bias": b_ih + b_hh,                   # (4D,)
        "w_cls_t": w_cls.T,                    # (D, C)
        "b_cls": b_cls,                        # (C,)
    }


if __name__ == "__main__":
    vector_dim = 32
    sentence_length = 8
    vocab_size = 28                            # e.g. pad + a..z + unk
    batch = 4

    key = jax.random.PRNGKey(0)
    pkey, xkey = jax.random.split(key)
    params = init_params(pkey, vocab_size, vector_dim, sentence_length)
    kp = prepare_params(params)
    forward = make_forward(kp)

    x_ids = jax.random.randint(xkey, (batch, sentence_length), 0, vocab_size, jnp.int32)

    preds, logits = forward(x_ids)
    preds = jax.block_until_ready(preds)
    logits = jax.block_until_ready(logits)

    ref_preds, ref_logits = reference_forward(x_ids, params)

    # bf16 MXU operands -> loosened logits tolerance vs the f32 reference.
    assert jnp.allclose(logits, ref_logits, atol=5e-2, rtol=5e-2), "logits mismatch"
    # In-kernel argmax must agree with host argmax of the kernel's own logits.
    assert jnp.array_equal(preds, jnp.argmax(logits, axis=1)), "in-kernel argmax mismatch"
    # vs f32 reference argmax: only enforced where the reference top-2 margin exceeds
    # the bf16 numeric error (near-ties may legitimately flip under bf16 operands).
    srt = jnp.sort(ref_logits, axis=1)
    margin = srt[:, -1] - srt[:, -2]
    ok = (preds == ref_preds) | (margin <= 5e-2)
    assert bool(jnp.all(ok)), "argmax mismatch beyond bf16 tolerance"

    # TODO(synk): CrossEntropyLoss training branch (y is not None) is not implemented; inference path only.
    print("KERNEL_OK")
</pallas_src>

<mosaic_0001>
module attributes {stable_mosaic.version = 11 : i64} {
  func.func @kernel(%arg0: memref<8x8xi32, #tpu.memory_space<vmem>>, %arg1: memref<128x32xf32, #tpu.memory_space<vmem>>, %arg2: memref<32x128xf32, #tpu.memory_space<vmem>>, %arg3: memref<32x128xf32, #tpu.memory_space<vmem>>, %arg4: memref<1x128xf32, #tpu.memory_space<vmem>>, %arg5: memref<32x128xf32, #tpu.memory_space<vmem>>, %arg6: memref<1x128xf32, #tpu.memory_space<vmem>>, %arg7: memref<8x1xi32, #tpu.memory_space<vmem>>, %arg8: memref<8x128xf32, #tpu.memory_space<vmem>>) attributes {dimension_semantics = [], scalar_prefetch = 0 : i64, scratch_operands = 0 : i64, tpu.core_type = #tpu.core_type<tc>} {
    %c0 = arith.constant 0 : index
    %c0_0 = arith.constant 0 : index
    %0 = vector.load %arg1[%c0, %c0_0] : memref<128x32xf32, #tpu.memory_space<vmem>>, vector<128x32xf32>
    %1 = arith.truncf %0 : vector<128x32xf32> to vector<128x32xbf16>
    %c0_1 = arith.constant 0 : index
    %c0_2 = arith.constant 0 : index
    %2 = vector.load %arg2[%c0_1, %c0_2] : memref<32x128xf32, #tpu.memory_space<vmem>>, vector<32x128xf32>
    %3 = arith.truncf %2 : vector<32x128xf32> to vector<32x128xbf16>
    %cst = arith.constant dense<0.000000e+00> : vector<128x128xf32>
    %4 = tpu.matmul %1, %3, %cst {dimension_numbers = #tpu.dot_dimension_numbers<[1], [0], [0], [1], [0, 0, 1, 1], [], []>} : vector<128x32xbf16>, vector<32x128xbf16>, vector<128x128xf32> -> vector<128x128xf32>
    %5 = arith.truncf %4 : vector<128x128xf32> to vector<128x128xbf16>
    %c0_3 = arith.constant 0 : index
    %c0_4 = arith.constant 0 : index
    %6 = vector.load %arg3[%c0_3, %c0_4] : memref<32x128xf32, #tpu.memory_space<vmem>>, vector<32x128xf32>
    %7 = arith.truncf %6 : vector<32x128xf32> to vector<32x128xbf16>
    %c0_5 = arith.constant 0 : index
    %c0_6 = arith.constant 0 : index
    %8 = vector.load %arg4[%c0_5, %c0_6] : memref<1x128xf32, #tpu.memory_space<vmem>>, vector<1x128xf32>
    %9 = vector.shape_cast %8 : vector<1x128xf32> to vector<1x128xf32>
    %10 = vector.broadcast %9 : vector<1x128xf32> to vector<8x128xf32>
    %11 = tpu.iota {dimensions = array<i32: 1>} : vector<8x128xi32>
    %c64_i32 = arith.constant 64 : i32
    %12 = vector.broadcast %c64_i32 : i32 to vector<8x128xi32>
    %13 = arith.cmpi sge, %11, %12 : vector<8x128xi32>
    %c96_i32 = arith.constant 96 : i32
    %14 = vector.broadcast %c96_i32 : i32 to vector<8x128xi32>
    %15 = arith.cmpi slt, %11, %14 : vector<8x128xi32>
    %16 = arith.andi %13, %15 : vector<8x128xi1>
    %cst_7 = arith.constant 1.000000e+00 : f32
    %cst_8 = arith.constant 5.000000e-01 : f32
    %17 = vector.broadcast %cst_7 : f32 to vector<8x128xf32>
    %18 = vector.broadcast %cst_8 : f32 to vector<8x128xf32>
    %19 = arith.select %16, %17, %18 : vector<8x128xi1>, vector<8x128xf32>
    %cst_9 = arith.constant 0.000000e+00 : f32
    %cst_10 = arith.constant 5.000000e-01 : f32
    %20 = vector.broadcast %cst_9 : f32 to vector<8x128xf32>
    %21 = vector.broadcast %cst_10 : f32 to vector<8x128xf32>
    %22 = arith.select %16, %20, %21 : vector<8x128xi1>, vector<8x128xf32>
    %c0_11 = arith.constant 0 : index
    %c0_12 = arith.constant 0 : index
    %23 = vector.load %arg0[%c0_11, %c0_12] : memref<8x8xi32, #tpu.memory_space<vmem>>, vector<8x8xi32>
    %24 = tpu.iota {dimensions = array<i32: 1>} : vector<8x128xi32>
    %cst_13 = arith.constant 0.000000e+00 : f32
    %25 = vector.broadcast %cst_13 : f32 to vector<8x32xf32>
    %cst_14 = arith.constant 0.000000e+00 : f32
    %26 = vector.broadcast %cst_14 : f32 to vector<8x32xf32>
    %27 = vector.extract_strided_slice %23 {offsets = [0, 0], sizes = [8, 1], strides = [1, 1]} : vector<8x8xi32> to vector<8x1xi32>
    %28 = vector.broadcast %27 : vector<8x1xi32> to vector<8x128xi32>
    %29 = arith.cmpi eq, %24, %28 : vector<8x128xi32>
    %cst_15 = arith.constant 1.000000e+00 : f32
    %cst_16 = arith.constant 0.000000e+00 : f32
    %30 = vector.broadcast %cst_15 : f32 to vector<8x128xf32>
    %31 = vector.broadcast %cst_16 : f32 to vector<8x128xf32>
    %32 = arith.select %29, %30, %31 : vector<8x128xi1>, vector<8x128xf32>
    %33 = arith.truncf %32 : vector<8x128xf32> to vector<8x128xbf16>
    %cst_17 = arith.constant dense<0.000000e+00> : vector<8x128xf32>
    %34 = tpu.matmul %33, %5, %cst_17 {dimension_numbers = #tpu.dot_dimension_numbers<[1], [0], [0], [1], [0, 0, 1, 1], [], []>} : vector<8x128xbf16>, vector<128x128xbf16>, vector<8x128xf32> -> vector<8x128xf32>
    %35 = arith.truncf %25 : vector<8x32xf32> to vector<8x32xbf16>
    %cst_18 = arith.constant dense<0.000000e+00> : vector<8x128xf32>
    %36 = tpu.matmul %35, %7, %cst_18 {dimension_numbers = #tpu.dot_dimension_numbers<[1], [0], [0], [1], [0, 0, 1, 1], [], []>} : vector<8x32xbf16>, vector<32x128xbf16>, vector<8x128xf32> -> vector<8x128xf32>
    %37 = arith.addf %34, %36 : vector<8x128xf32>
    %38 = arith.addf %37, %10 : vector<8x128xf32>
    %39 = arith.mulf %38, %19 : vector<8x128xf32>
    %40 = math.tanh %39 : vector<8x128xf32>
    %41 = arith.mulf %40, %19 : vector<8x128xf32>
    %42 = arith.addf %41, %22 : vector<8x128xf32>
    %43 = vector.extract_strided_slice %42 {offsets = [0, 0], sizes = [8, 32], strides = [1, 1]} : vector<8x128xf32> to vector<8x32xf32>
    %44 = vector.extract_strided_slice %42 {offsets = [0, 32], sizes = [8, 32], strides = [1, 1]} : vector<8x128xf32> to vector<8x32xf32>
    %45 = vector.extract_strided_slice %42 {offsets = [0, 64], sizes = [8, 32], strides = [1, 1]} : vector<8x128xf32> to vector<8x32xf32>
    %46 = vector.extract_strided_slice %42 {offsets = [0, 96], sizes = [8, 32], strides = [1, 1]} : vector<8x128xf32> to vector<8x32xf32>
    %47 = arith.mulf %44, %26 : vector<8x32xf32>
    %48 = arith.mulf %43, %45 : vector<8x32xf32>
    %49 = arith.addf %47, %48 : vector<8x32xf32>
    %50 = math.tanh %49 : vector<8x32xf32>
    %51 = arith.mulf %46, %50 : vector<8x32xf32>
    %52 = vector.extract_strided_slice %23 {offsets = [0, 1], sizes = [8, 1], strides = [1, 1]} : vector<8x8xi32> to vector<8x1xi32>
    %53 = vector.broadcast %52 : vector<8x1xi32> to vector<8x128xi32>
    %54 = arith.cmpi eq, %24, %53 : vector<8x128xi32>
    %cst_19 = arith.constant 1.000000e+00 : f32
    %cst_20 = arith.constant 0.000000e+00 : f32
    %55 = vector.broadcast %cst_19 : f32 to vector<8x128xf32>
    %56 = vector.broadcast %cst_20 : f32 to vector<8x128xf32>
    %57 = arith.select %54, %55, %56 : vector<8x128xi1>, vector<8x128xf32>
    %58 = arith.truncf %57 : vector<8x128xf32> to vector<8x128xbf16>
    %cst_21 = arith.constant dense<0.000000e+00> : vector<8x128xf32>
    %59 = tpu.matmul %58, %5, %cst_21 {dimension_numbers = #tpu.dot_dimension_numbers<[1], [0], [0], [1], [0, 0, 1, 1], [], []>} : vector<8x128xbf16>, vector<128x128xbf16>, vector<8x128xf32> -> vector<8x128xf32>
    %60 = arith.truncf %51 : vector<8x32xf32> to vector<8x32xbf16>
    %cst_22 = arith.constant dense<0.000000e+00> : vector<8x128xf32>
    %61 = tpu.matmul %60, %7, %cst_22 {dimension_numbers = #tpu.dot_dimension_numbers<[1], [0], [0], [1], [0, 0, 1, 1], [], []>} : vector<8x32xbf16>, vector<32x128xbf16>, vector<8x128xf32> -> vector<8x128xf32>
    %62 = arith.addf %59, %61 : vector<8x128xf32>
    %63 = arith.addf %62, %10 : vector<8x128xf32>
    %64 = arith.mulf %63, %19 : vector<8x128xf32>
    %65 = math.tanh %64 : vector<8x128xf32>
    %66 = arith.mulf %65, %19 : vector<8x128xf32>
    %67 = arith.addf %66, %22 : vector<8x128xf32>
    %68 = vector.extract_strided_slice %67 {offsets = [0, 0], sizes = [8, 32], strides = [1, 1]} : vector<8x128xf32> to vector<8x32xf32>
    %69 = vector.extract_strided_slice %67 {offsets = [0, 32], sizes = [8, 32], strides = [1, 1]} : vector<8x128xf32> to vector<8x32xf32>
    %70 = vector.extract_strided_slice %67 {offsets = [0, 64], sizes = [8, 32], strides = [1, 1]} : vector<8x128xf32> to vector<8x32xf32>
    %71 = vector.extract_strided_slice %67 {offsets = [0, 96], sizes = [8, 32], strides = [1, 1]} : vector<8x128xf32> to vector<8x32xf32>
    %72 = arith.mulf %69, %49 : vector<8x32xf32>
    %73 = arith.mulf %68, %70 : vector<8x32xf32>
    %74 = arith.addf %72, %73 : vector<8x32xf32>
    %75 = math.tanh %74 : vector<8x32xf32>
    %76 = arith.mulf %71, %75 : vector<8x32xf32>
    %77 = vector.extract_strided_slice %23 {offsets = [0, 2], sizes = [8, 1], strides = [1, 1]} : vector<8x8xi32> to vector<8x1xi32>
    %78 = vector.broadcast %77 : vector<8x1xi32> to vector<8x128xi32>
    %79 = arith.cmpi eq, %24, %78 : vector<8x128xi32>
    %cst_23 = arith.constant 1.000000e+00 : f32
    %cst_24 = arith.constant 0.000000e+00 : f32
    %80 = vector.broadcast %cst_23 : f32 to vector<8x128xf32>
    %81 = vector.broadcast %cst_24 : f32 to vector<8x128xf32>
    %82 = arith.select %79, %80, %81 : vector<8x128xi1>, vector<8x128xf32>
    %83 = arith.truncf %82 : vector<8x128xf32> to vector<8x128xbf16>
    %cst_25 = arith.constant dense<0.000000e+00> : vector<8x128xf32>
    %84 = tpu.matmul %83, %5, %cst_25 {dimension_numbers = #tpu.dot_dimension_numbers<[1], [0], [0], [1], [0, 0, 1, 1], [], []>} : vector<8x128xbf16>, vector<128x128xbf16>, vector<8x128xf32> -> vector<8x128xf32>
    %85 = arith.truncf %76 : vector<8x32xf32> to vector<8x32xbf16>
    %cst_26 = arith.constant dense<0.000000e+00> : vector<8x128xf32>
    %86 = tpu.matmul %85, %7, %cst_26 {dimension_numbers = #tpu.dot_dimension_numbers<[1], [0], [0], [1], [0, 0, 1, 1], [], []>} : vector<8x32xbf16>, vector<32x128xbf16>, vector<8x128xf32> -> vector<8x128xf32>
    %87 = arith.addf %84, %86 : vector<8x128xf32>
    %88 = arith.addf %87, %10 : vector<8x128xf32>
    %89 = arith.mulf %88, %19 : vector<8x128xf32>
    %90 = math.tanh %89 : vector<8x128xf32>
    %91 = arith.mulf %90, %19 : vector<8x128xf32>
    %92 = arith.addf %91, %22 : vector<8x128xf32>
    %93 = vector.extract_strided_slice %92 {offsets = [0, 0], sizes = [8, 32], strides = [1, 1]} : vector<8x128xf32> to vector<8x32xf32>
    %94 = vector.extract_strided_slice %92 {offsets = [0, 32], sizes = [8, 32], strides = [1, 1]} : vector<8x128xf32> to vector<8x32xf32>
    %95 = vector.extract_strided_slice %92 {offsets = [0, 64], sizes = [8, 32], strides = [1, 1]} : vector<8x128xf32> to vector<8x32xf32>
    %96 = vector.extract_strided_slice %92 {offsets = [0, 96], sizes = [8, 32], strides = [1, 1]} : vector<8x128xf32> to vector<8x32xf32>
    %97 = arith.mulf %94, %74 : vector<8x32xf32>
    %98 = arith.mulf %93, %95 : vector<8x32xf32>
    %99 = arith.addf %97, %98 : vector<8x32xf32>
    %100 = math.tanh %99 : vector<8x32xf32>
    %101 = arith.mulf %96, %100 : vector<8x32xf32>
    %102 = vector.extract_strided_slice %23 {offsets = [0, 3], sizes = [8, 1], strides = [1, 1]} : vector<8x8xi32> to vector<8x1xi32>
    %103 = vector.broadcast %102 : vector<8x1xi32> to vector<8x128xi32>
    %104 = arith.cmpi eq, %24, %103 : vector<8x128xi32>
    %cst_27 = arith.constant 1.000000e+00 : f32
    %cst_28 = arith.constant 0.000000e+00 : f32
    %105 = vector.broadcast %cst_27 : f32 to vector<8x128xf32>
    %106 = vector.broadcast %cst_28 : f32 to vector<8x128xf32>
    %107 = arith.select %104, %105, %106 : vector<8x128xi1>, vector<8x128xf32>
    %108 = arith.truncf %107 : vector<8x128xf32> to vector<8x128xbf16>
    %cst_29 = arith.constant dense<0.000000e+00> : vector<8x128xf32>
    %109 = tpu.matmul %108, %5, %cst_29 {dimension_numbers = #tpu.dot_dimension_numbers<[1], [0], [0], [1], [0, 0, 1, 1], [], []>} : vector<8x128xbf16>, vector<128x128xbf16>, vector<8x128xf32> -> vector<8x128xf32>
    %110 = arith.truncf %101 : vector<8x32xf32> to vector<8x32xbf16>
    %cst_30 = arith.constant dense<0.000000e+00> : vector<8x128xf32>
    %111 = tpu.matmul %110, %7, %cst_30 {dimension_numbers = #tpu.dot_dimension_numbers<[1], [0], [0], [1], [0, 0, 1, 1], [], []>} : vector<8x32xbf16>, vector<32x128xbf16>, vector<8x128xf32> -> vector<8x128xf32>
    %112 = arith.addf %109, %111 : vector<8x128xf32>
    %113 = arith.addf %112, %10 : vector<8x128xf32>
    %114 = arith.mulf %113, %19 : vector<8x128xf32>
    %115 = math.tanh %114 : vector<8x128xf32>
    %116 = arith.mulf %115, %19 : vector<8x128xf32>
    %117 = arith.addf %116, %22 : vector<8x128xf32>
    %118 = vector.extract_strided_slice %117 {offsets = [0, 0], sizes = [8, 32], strides = [1, 1]} : vector<8x128xf32> to vector<8x32xf32>
    %119 = vector.extract_strided_slice %117 {offsets = [0, 32], sizes = [8, 32], strides = [1, 1]} : vector<8x128xf32> to vector<8x32xf32>
    %120 = vector.extract_strided_slice %117 {offsets = [0, 64], sizes = [8, 32], strides = [1, 1]} : vector<8x128xf32> to vector<8x32xf32>
    %121 = vector.extract_strided_slice %117 {offsets = [0, 96], sizes = [8, 32], strides = [1, 1]} : vector<8x128xf32> to vector<8x32xf32>
    %122 = arith.mulf %119, %99 : vector<8x32xf32>
    %123 = arith.mulf %118, %120 : vector<8x32xf32>
    %124 = arith.addf %122, %123 : vector<8x32xf32>
    %125 = math.tanh %124 : vector<8x32xf32>
    %126 = arith.mulf %121, %125 : vector<8x32xf32>
    %127 = vector.extract_strided_slice %23 {offsets = [0, 4], sizes = [8, 1], strides = [1, 1]} : vector<8x8xi32> to vector<8x1xi32>
    %128 = vector.broadcast %127 : vector<8x1xi32> to vector<8x128xi32>
    %129 = arith.cmpi eq, %24, %128 : vector<8x128xi32>
    %cst_31 = arith.constant 1.000000e+00 : f32
    %cst_32 = arith.constant 0.000000e+00 : f32
    %130 = vector.broadcast %cst_31 : f32 to vector<8x128xf32>
    %131 = vector.broadcast %cst_32 : f32 to vector<8x128xf32>
    %132 = arith.select %129, %130, %131 : vector<8x128xi1>, vector<8x128xf32>
    %133 = arith.truncf %132 : vector<8x128xf32> to vector<8x128xbf16>
    %cst_33 = arith.constant dense<0.000000e+00> : vector<8x128xf32>
    %134 = tpu.matmul %133, %5, %cst_33 {dimension_numbers = #tpu.dot_dimension_numbers<[1], [0], [0], [1], [0, 0, 1, 1], [], []>} : vector<8x128xbf16>, vector<128x128xbf16>, vector<8x128xf32> -> vector<8x128xf32>
    %135 = arith.truncf %126 : vector<8x32xf32> to vector<8x32xbf16>
    %cst_34 = arith.constant dense<0.000000e+00> : vector<8x128xf32>
    %136 = tpu.matmul %135, %7, %cst_34 {dimension_numbers = #tpu.dot_dimension_numbers<[1], [0], [0], [1], [0, 0, 1, 1], [], []>} : vector<8x32xbf16>, vector<32x128xbf16>, vector<8x128xf32> -> vector<8x128xf32>
    %137 = arith.addf %134, %136 : vector<8x128xf32>
    %138 = arith.addf %137, %10 : vector<8x128xf32>
    %139 = arith.mulf %138, %19 : vector<8x128xf32>
    %140 = math.tanh %139 : vector<8x128xf32>
    %141 = arith.mulf %140, %19 : vector<8x128xf32>
    %142 = arith.addf %141, %22 : vector<8x128xf32>
    %143 = vector.extract_strided_slice %142 {offsets = [0, 0], sizes = [8, 32], strides = [1, 1]} : vector<8x128xf32> to vector<8x32xf32>
    %144 = vector.extract_strided_slice %142 {offsets = [0, 32], sizes = [8, 32], strides = [1, 1]} : vector<8x128xf32> to vector<8x32xf32>
    %145 = vector.extract_strided_slice %142 {offsets = [0, 64], sizes = [8, 32], strides = [1, 1]} : vector<8x128xf32> to vector<8x32xf32>
    %146 = vector.extract_strided_slice %142 {offsets = [0, 96], sizes = [8, 32], strides = [1, 1]} : vector<8x128xf32> to vector<8x32xf32>
    %147 = arith.mulf %144, %124 : vector<8x32xf32>
    %148 = arith.mulf %143, %145 : vector<8x32xf32>
    %149 = arith.addf %147, %148 : vector<8x32xf32>
    %150 = math.tanh %149 : vector<8x32xf32>
    %151 = arith.mulf %146, %150 : vector<8x32xf32>
    %152 = vector.extract_strided_slice %23 {offsets = [0, 5], sizes = [8, 1], strides = [1, 1]} : vector<8x8xi32> to vector<8x1xi32>
    %153 = vector.broadcast %152 : vector<8x1xi32> to vector<8x128xi32>
    %154 = arith.cmpi eq, %24, %153 : vector<8x128xi32>
    %cst_35 = arith.constant 1.000000e+00 : f32
    %cst_36 = arith.constant 0.000000e+00 : f32
    %155 = vector.broadcast %cst_35 : f32 to vector<8x128xf32>
    %156 = vector.broadcast %cst_36 : f32 to vector<8x128xf32>
    %157 = arith.select %154, %155, %156 : vector<8x128xi1>, vector<8x128xf32>
    %158 = arith.truncf %157 : vector<8x128xf32> to vector<8x128xbf16>
    %cst_37 = arith.constant dense<0.000000e+00> : vector<8x128xf32>
    %159 = tpu.matmul %158, %5, %cst_37 {dimension_numbers = #tpu.dot_dimension_numbers<[1], [0], [0], [1], [0, 0, 1, 1], [], []>} : vector<8x128xbf16>, vector<128x128xbf16>, vector<8x128xf32> -> vector<8x128xf32>
    %160 = arith.truncf %151 : vector<8x32xf32> to vector<8x32xbf16>
    %cst_38 = arith.constant dense<0.000000e+00> : vector<8x128xf32>
    %161 = tpu.matmul %160, %7, %cst_38 {dimension_numbers = #tpu.dot_dimension_numbers<[1], [0], [0], [1], [0, 0, 1, 1], [], []>} : vector<8x32xbf16>, vector<32x128xbf16>, vector<8x128xf32> -> vector<8x128xf32>
    %162 = arith.addf %159, %161 : vector<8x128xf32>
    %163 = arith.addf %162, %10 : vector<8x128xf32>
    %164 = arith.mulf %163, %19 : vector<8x128xf32>
    %165 = math.tanh %164 : vector<8x128xf32>
    %166 = arith.mulf %165, %19 : vector<8x128xf32>
    %167 = arith.addf %166, %22 : vector<8x128xf32>
    %168 = vector.extract_strided_slice %167 {offsets = [0, 0], sizes = [8, 32], strides = [1, 1]} : vector<8x128xf32> to vector<8x32xf32>
    %169 = vector.extract_strided_slice %167 {offsets = [0, 32], sizes = [8, 32], strides = [1, 1]} : vector<8x128xf32> to vector<8x32xf32>
    %170 = vector.extract_strided_slice %167 {offsets = [0, 64], sizes = [8, 32], strides = [1, 1]} : vector<8x128xf32> to vector<8x32xf32>
    %171 = vector.extract_strided_slice %167 {offsets = [0, 96], sizes = [8, 32], strides = [1, 1]} : vector<8x128xf32> to vector<8x32xf32>
    %172 = arith.mulf %169, %149 : vector<8x32xf32>
    %173 = arith.mulf %168, %170 : vector<8x32xf32>
    %174 = arith.addf %172, %173 : vector<8x32xf32>
    %175 = math.tanh %174 : vector<8x32xf32>
    %176 = arith.mulf %171, %175 : vector<8x32xf32>
    %177 = vector.extract_strided_slice %23 {offsets = [0, 6], sizes = [8, 1], strides = [1, 1]} : vector<8x8xi32> to vector<8x1xi32>
    %178 = vector.broadcast %177 : vector<8x1xi32> to vector<8x128xi32>
    %179 = arith.cmpi eq, %24, %178 : vector<8x128xi32>
    %cst_39 = arith.constant 1.000000e+00 : f32
    %cst_40 = arith.constant 0.000000e+00 : f32
    %180 = vector.broadcast %cst_39 : f32 to vector<8x128xf32>
    %181 = vector.broadcast %cst_40 : f32 to vector<8x128xf32>
    %182 = arith.select %179, %180, %181 : vector<8x128xi1>, vector<8x128xf32>
    %183 = arith.truncf %182 : vector<8x128xf32> to vector<8x128xbf16>
    %cst_41 = arith.constant dense<0.000000e+00> : vector<8x128xf32>
    %184 = tpu.matmul %183, %5, %cst_41 {dimension_numbers = #tpu.dot_dimension_numbers<[1], [0], [0], [1], [0, 0, 1, 1], [], []>} : vector<8x128xbf16>, vector<128x128xbf16>, vector<8x128xf32> -> vector<8x128xf32>
    %185 = arith.truncf %176 : vector<8x32xf32> to vector<8x32xbf16>
    %cst_42 = arith.constant dense<0.000000e+00> : vector<8x128xf32>
    %186 = tpu.matmul %185, %7, %cst_42 {dimension_numbers = #tpu.dot_dimension_numbers<[1], [0], [0], [1], [0, 0, 1, 1], [], []>} : vector<8x32xbf16>, vector<32x128xbf16>, vector<8x128xf32> -> vector<8x128xf32>
    %187 = arith.addf %184, %186 : vector<8x128xf32>
    %188 = arith.addf %187, %10 : vector<8x128xf32>
    %189 = arith.mulf %188, %19 : vector<8x128xf32>
    %190 = math.tanh %189 : vector<8x128xf32>
    %191 = arith.mulf %190, %19 : vector<8x128xf32>
    %192 = arith.addf %191, %22 : vector<8x128xf32>
    %193 = vector.extract_strided_slice %192 {offsets = [0, 0], sizes = [8, 32], strides = [1, 1]} : vector<8x128xf32> to vector<8x32xf32>
    %194 = vector.extract_strided_slice %192 {offsets = [0, 32], sizes = [8, 32], strides = [1, 1]} : vector<8x128xf32> to vector<8x32xf32>
    %195 = vector.extract_strided_slice %192 {offsets = [0, 64], sizes = [8, 32], strides = [1, 1]} : vector<8x128xf32> to vector<8x32xf32>
    %196 = vector.extract_strided_slice %192 {offsets = [0, 96], sizes = [8, 32], strides = [1, 1]} : vector<8x128xf32> to vector<8x32xf32>
    %197 = arith.mulf %194, %174 : vector<8x32xf32>
    %198 = arith.mulf %193, %195 : vector<8x32xf32>
    %199 = arith.addf %197, %198 : vector<8x32xf32>
    %200 = math.tanh %199 : vector<8x32xf32>
    %201 = arith.mulf %196, %200 : vector<8x32xf32>
    %202 = vector.extract_strided_slice %23 {offsets = [0, 7], sizes = [8, 1], strides = [1, 1]} : vector<8x8xi32> to vector<8x1xi32>
    %203 = vector.broadcast %202 : vector<8x1xi32> to vector<8x128xi32>
    %204 = arith.cmpi eq, %24, %203 : vector<8x128xi32>
    %cst_43 = arith.constant 1.000000e+00 : f32
    %cst_44 = arith.constant 0.000000e+00 : f32
    %205 = vector.broadcast %cst_43 : f32 to vector<8x128xf32>
    %206 = vector.broadcast %cst_44 : f32 to vector<8x128xf32>
    %207 = arith.select %204, %205, %206 : vector<8x128xi1>, vector<8x128xf32>
    %208 = arith.truncf %207 : vector<8x128xf32> to vector<8x128xbf16>
    %cst_45 = arith.constant dense<0.000000e+00> : vector<8x128xf32>
    %209 = tpu.matmul %208, %5, %cst_45 {dimension_numbers = #tpu.dot_dimension_numbers<[1], [0], [0], [1], [0, 0, 1, 1], [], []>} : vector<8x128xbf16>, vector<128x128xbf16>, vector<8x128xf32> -> vector<8x128xf32>
    %210 = arith.truncf %201 : vector<8x32xf32> to vector<8x32xbf16>
    %cst_46 = arith.constant dense<0.000000e+00> : vector<8x128xf32>
    %211 = tpu.matmul %210, %7, %cst_46 {dimension_numbers = #tpu.dot_dimension_numbers<[1], [0], [0], [1], [0, 0, 1, 1], [], []>} : vector<8x32xbf16>, vector<32x128xbf16>, vector<8x128xf32> -> vector<8x128xf32>
    %212 = arith.addf %209, %211 : vector<8x128xf32>
    %213 = arith.addf %212, %10 : vector<8x128xf32>
    %214 = arith.mulf %213, %19 : vector<8x128xf32>
    %215 = math.tanh %214 : vector<8x128xf32>
    %216 = arith.mulf %215, %19 : vector<8x128xf32>
    %217 = arith.addf %216, %22 : vector<8x128xf32>
    %218 = vector.extract_strided_slice %217 {offsets = [0, 0], sizes = [8, 32], strides = [1, 1]} : vector<8x128xf32> to vector<8x32xf32>
    %219 = vector.extract_strided_slice %217 {offsets = [0, 32], sizes = [8, 32], strides = [1, 1]} : vector<8x128xf32> to vector<8x32xf32>
    %220 = vector.extract_strided_slice %217 {offsets = [0, 64], sizes = [8, 32], strides = [1, 1]} : vector<8x128xf32> to vector<8x32xf32>
    %221 = vector.extract_strided_slice %217 {offsets = [0, 96], sizes = [8, 32], strides = [1, 1]} : vector<8x128xf32> to vector<8x32xf32>
    %222 = arith.mulf %219, %199 : vector<8x32xf32>
    %223 = arith.mulf %218, %220 : vector<8x32xf32>
    %224 = arith.addf %222, %223 : vector<8x32xf32>
    %225 = math.tanh %224 : vector<8x32xf32>
    %226 = arith.mulf %221, %225 : vector<8x32xf32>
    %c0_47 = arith.constant 0 : index
    %c0_48 = arith.constant 0 : index
    %227 = vector.load %arg5[%c0_47, %c0_48] : memref<32x128xf32, #tpu.memory_space<vmem>>, vector<32x128xf32>
    %cst_49 = arith.constant dense<0.000000e+00> : vector<8x128xf32>
    %228 = tpu.matmul %226, %227, %cst_49 {dimension_numbers = #tpu.dot_dimension_numbers<[1], [0], [0], [1], [0, 0, 1, 1], [], []>} : vector<8x32xf32>, vector<32x128xf32>, vector<8x128xf32> -> vector<8x128xf32>
    %c0_50 = arith.constant 0 : index
    %c0_51 = arith.constant 0 : index
    %229 = vector.load %arg6[%c0_50, %c0_51] : memref<1x128xf32, #tpu.memory_space<vmem>>, vector<1x128xf32>
    %230 = vector.broadcast %229 : vector<1x128xf32> to vector<8x128xf32>
    %231 = arith.addf %228, %230 : vector<8x128xf32>
    %232 = tpu.iota {dimensions = array<i32: 1>} : vector<8x128xi32>
    %c9_i32 = arith.constant 9 : i32
    %233 = vector.broadcast %c9_i32 : i32 to vector<8x128xi32>
    %234 = arith.cmpi slt, %232, %233 : vector<8x128xi32>
    %cst_52 = arith.constant 0xFF800000 : f32
    %235 = vector.broadcast %cst_52 : f32 to vector<8x128xf32>
    %236 = arith.select %234, %231, %235 : vector<8x128xi1>, vector<8x128xf32>
    %c0_53 = arith.constant 0 : index
    %c0_54 = arith.constant 0 : index
    %237 = vector.load %arg8[%c0_53, %c0_54] : memref<8x128xf32, #tpu.memory_space<vmem>>, vector<8x128xf32>
    tpu.vector_store %arg8[%c0_53, %c0_54], %236 {strides = array<i32>} : memref<8x128xf32, #tpu.memory_space<vmem>>, vector<8x128xf32>,
    %cst_55 = arith.constant dense<0xFF800000> : vector<8xf32>
    %238 = vector.multi_reduction <maximumf>, %236, %cst_55 [1] : vector<8x128xf32> to vector<8xf32>
    %239 = vector.shape_cast %238 : vector<8xf32> to vector<8x1xf32>
    %240 = vector.broadcast %239 : vector<8x1xf32> to vector<8x128xf32>
    %241 = arith.cmpf oeq, %236, %240 : vector<8x128xf32>
    %242 = arith.sitofp %232 : vector<8x128xi32> to vector<8x128xf32>
    %cst_56 = arith.constant 1.280000e+02 : f32
    %243 = vector.broadcast %cst_56 : f32 to vector<8x128xf32>
    %244 = arith.select %241, %242, %243 : vector<8x128xi1>, vector<8x128xf32>
    %cst_57 = arith.constant dense<0x7F800000> : vector<8xf32>
    %245 = vector.multi_reduction <minimumf>, %244, %cst_57 [1] : vector<8x128xf32> to vector<8xf32>
    %246 = vector.shape_cast %245 : vector<8xf32> to vector<8x1xf32>
    %247 = arith.fptosi %246 : vector<8x1xf32> to vector<8x1xi32>
    %c0_58 = arith.constant 0 : index
    %c0_59 = arith.constant 0 : index
    %248 = vector.load %arg7[%c0_58, %c0_59] : memref<8x1xi32, #tpu.memory_space<vmem>>, vector<8x1xi32>
    tpu.vector_store %arg7[%c0_58, %c0_59], %247 {strides = array<i32>} : memref<8x1xi32, #tpu.memory_space<vmem>>, vector<8x1xi32>,
    return
  }
}

</mosaic_0001>

<bundles_post_ra>
// kernel: _forward.1
= control target key start
LH: loop header
LB: loop body
LE: loop exit
PB: predicated region body
PF: predicated region fallthrough
CT: control target
= control target key end

     0   :  { %v1689_v3 = vmov 0   ;;  %vm59_vm0 = vcmask 261120   ;;  %v1690_v32 = vmov 0.0   ;;  %vm1691_vm1 = vmmov 0   ;;  %s1695_s30 = smov 32   ;;  %s2183_s2 = inlined_call_operand.vmem [shape: f32[32,128], index: 2, kind: input, shape index: {}]   ;;  %s2184_s1 = inlined_call_operand.vmem [shape: f32[128,32], index: 1, kind: input, shape index: {}]   ;;  %s2185_s0 = inlined_call_operand.vmem [shape: s32[8,8], index: 0, kind: input, shape index: {}]   ;;  %s2186_s3 = inlined_call_operand.vmem [shape: f32[32,128], index: 3, kind: input, shape index: {}]   ;;  %s2187_s4 = inlined_call_operand.vmem [shape: f32[1,128], index: 4, kind: input, shape index: {}]   ;;  %s2188_s5 = inlined_call_operand.vmem [shape: f32[32,128], index: 5, kind: input, shape index: {}]   ;;  %s2189_s6 = inlined_call_operand.vmem [shape: f32[1,128], index: 6, kind: input, shape index: {}]   ;;  %s2190_s8 = inlined_call_operand.vmem [shape: f32[8,128], index: 8, kind: output, shape index: {1}]   ;;  %s2191_s7 = inlined_call_operand.vmem [shape: s32[8,1], index: 7, kind: output, shape index: {0}]  }
   0x1   :  { %v55_v0 = vld [vmem:[%s2183_s2 + $0x10] sm:$0xff]  ;;  %v56_v1 = vld [vmem:[%s2183_s2 + $0x18] sm:$0xff]  ;;  %v53_v2 = vld [vmem:[%s2183_s2] sm:$0xff]  ;;  %1649 = vset.pattern.permute.xlu0 %v1689_v3  ;;  %1398 = vmatprep.subr.bf16.mxu1 %v1690_v32  ;;  %v202_v60 = vlaneseq }
   0x2   :  { %v58_v4 = vpack.c.bf16 %v56_v1, %v55_v0  ;;  %v54_v5 = vld [vmem:[%s2183_s2 + $0x8] sm:$0xff]  ;;  %v29_v6 = vld [vmem:[%s2184_s1] sm:$0xff]  ;;  %v31_v10 = vld [vmem:[%s2184_s1 + $0x10] sm:$0xff]  ;;  %1402 = vmatprep.mubr.msk.bf16.mxu1 %vm1691_vm1, %v1690_v32 }
   0x3   :  { %v30_v7 = vld [vmem:[%s2184_s1 + $0x8] sm:$0xff]  ;;  %v57_v8 = vpack.c.bf16 %v54_v5, %v53_v2  ;;  %v32_v11 = vld [vmem:[%s2184_s1 + $0x18] sm:$0xff]  ;;  %v33_v12 = vld [vmem:[%s2184_s1 + $0x20] sm:$0xff]  ;;  %v1878_v62 = vand.u32 127, %v202_v60  ;;  %v1692_v2 = vmov 1.0|1.0  }
   0x4   :  { %v45_v9 = vpack.c.bf16 %v30_v7, %v29_v6  ;;  %1378 = vmatprep.subr.bf16.mxu0 %v58_v4  ;;  %v34_v13 = vld [vmem:[%s2184_s1 + $0x28] sm:$0xff]  ;;  %v1782_v14 = vld [vmem:[%s2185_s0] sm:$0xff]  ;;  %v46_v15 = vpack.c.bf16 %v32_v11, %v31_v10  ;;  %v35_v17 = vld [vmem:[%s2184_s1 + $0x30] sm:$0xff]  ;;  %v1693_v10 = vmov 0.5  }
   0x5   :  { %1379 = vmatpush3.bf16.msra.mxu0 %v58_v4  ;;  %211 = vperm.xlu0 %1649, %v1782_v14   ;;  %v47_v16 = vpack.c.bf16 %v34_v13, %v33_v12  ;;  %v36_v18 = vld [vmem:[%s2184_s1 + $0x38] sm:$0xff]  ;;  %v37_v19 = vld [vmem:[%s2184_s1 + $0x40] sm:$0xff]  ;;  %v38_v20 = vld [vmem:[%s2184_s1 + $0x48] sm:$0xff]  ;;  %vm204_vm4 = vcmp.ge.s32.totalorder %v1878_v62, 64  ;;  %vm205_vm5 = vcmp.lt.s32.totalorder %v1878_v62, 96 }
   0x6   :  { %1382 = vmatprep.mubr.msk.bf16.mxu0 %vm59_vm0, %v45_v9  ;;  %1380 = vmatprep.subr.bf16.mxu0 %v57_v8  ;;  %v48_v21 = vpack.c.bf16 %v36_v18, %v35_v17  ;;  %v49_v22 = vpack.c.bf16 %v38_v20, %v37_v19  ;;  %v39_v23 = vld [vmem:[%s2184_s1 + $0x50] sm:$0xff]  ;;  %v40_v24 = vld [vmem:[%s2184_s1 + $0x58] sm:$0xff]  ;;  %v41_v25 = vld [vmem:[%s2184_s1 + $0x60] sm:$0xff] }
   0x7   :  { %v42_v26 = vld [vmem:[%s2184_s1 + $0x68] sm:$0xff]  ;;  %v50_v27 = vpack.c.bf16 %v40_v24, %v39_v23  ;;  %v43_v29 = vld [vmem:[%s2184_s1 + $0x70] sm:$0xff]  ;;  %v44_v30 = vld [vmem:[%s2184_s1 + $0x78] sm:$0xff] }
   0x8   :  { %v51_v28 = vpack.c.bf16 %v42_v26, %v41_v25  ;;  %v52_v31 = vpack.c.bf16 %v44_v30, %v43_v29  ;;  %v191_v33 = vld [vmem:[%s2186_s3 + $0x10] sm:$0xff]  ;;  %v192_v34 = vld [vmem:[%s2186_s3 + $0x18] sm:$0xff]  ;;  %v189_v36 = vld [vmem:[%s2186_s3] sm:$0xff] }
   0x9   :  { %1381 = vmatpush3.bf16.msra.mxu0 %v57_v8  ;;  %v1830_v35 = vpack.c.bf16 %v192_v34, %v191_v33  ;;  %v190_v37 = vld [vmem:[%s2186_s3 + $0x8] sm:$0xff]  ;;  %vm206_vm6 = vmand %vm204_vm4, %vm205_vm5  ;;  %v1901_v7 = vld [vmem:[%s2187_s4] ss:$0 sm:$0xff]  ;;  %s1694_s4 = smov 64  }
   0xa   :  { %1406 = vmatprep.subr.bf16.mxu0 %v1690_v32  ;;  %v1840_v38 = vpack.c.bf16 %v190_v37, %v189_v36  ;;  %v1903_v11 = vsel %vm206_vm6, 1.0, %v1693_v10  ;;  %v1907_v19 = vsel %vm206_vm6, 0.0, %v1693_v10  ;;  %vm1212_vm6 = vcmp.lt.s32.totalorder %v1878_v62, 9 }
   0xb   :  { %1399 = vmatpush3.bf16.msra.mxu1 %v1830_v35 }
   0xc   :  { %1383 = vmatmul.mubr.msk.bf16.vlgmr.msra.gmra.mxu0 %vm59_vm0, %v46_v15  ;;  %1400 = vmatprep.subr.bf16.mxu1 %v1690_v32 }
   0xd   :  { %1386 = vmatprep.mubr.msk.bf16.mxu0 %vm59_vm0, %v47_v16 }
   0xf   :  { %1401 = vmatpush3.bf16.msra.mxu1 %v1840_v38 }
  0x10   :  { %1426 = vmatprep.subr.bf16.mxu1 %v1690_v32 }
  0x12   :  { %1403 = vmatmul.mubr.bf16.vlgmr.msra.gmra.mxu1 %v1689_v3 }
  0x13   :  { %1427 = vmatpush3.bf16.msra.mxu1 %v1830_v35  ;;  %1430 = vmatprep.mubr.msk.bf16.mxu1 %vm1691_vm1, %v1690_v32 }
  0x14   :  { %1387 = vmatmul.mubr.msk.bf16.gmra.mxu0 %vm59_vm0, %v48_v21  ;;  %1428 = vmatprep.subr.bf16.mxu1 %v1690_v32 }
  0x15   :  { %1390 = vmatprep.mubr.msk.bf16.mxu0 %vm59_vm0, %v49_v22 }
  0x17   :  { %1429 = vmatpush3.bf16.msra.mxu1 %v1840_v38 }
  0x18   :  { %1434 = vmatprep.subr.bf16.mxu1 %v1690_v32 }
  0x1c   :  { %1391 = vmatmul.mubr.msk.bf16.gmra.mxu0 %vm59_vm0, %v50_v27  ;;  %v1696_v27 = vmov 1  }
  0x1d   :  { %1394 = vmatprep.mubr.msk.bf16.mxu0 %vm59_vm0, %v51_v28  ;;  %1650 = vset.pattern.permute.xlu1 %v1696_v27 }
  0x24   :  { %1395 = vmatmul.mubr.msk.bf16.gmra.mxu0 %vm59_vm0, %v52_v31 }
  0x25   :  { %1422 = vmatprep.mubr.msk.bf16.mxu0 %vm1691_vm1, %v1690_v32 }
  0x80   :  { %v212_v0 = vpop.permute.xlu0 %211 }
  0x81   :  { %vm213_vm2 = vcmp.eq.s32.totalorder %v1878_v62, %v212_v0  ;;  %v1697_v0 = vmov 2  }
  0x82   :  { %vm1242_vm3 = vmpackc.low %vm213_vm2, %vm213_vm2  ;;  %1651 = vset.pattern.permute.xlu0 %v1697_v0 }
  0xcc   :  { %v1384_v39 = vpop.f32.mrf.mxu0 }
  0xce   :  { %v118_v40 = vpop.f32.mrf.mxu0 }
  0xd0   :  { %v1385_v41 = vpop.f32.mrf.mxu0 }
  0xd1   :  { %v1880_v63 = vpack.c.bf16 %v1385_v41, %v1384_v39 }
  0xd2   :  { %v121_v42 = vpop.f32.mrf.mxu0  ;;  %v253_v3 = vpop.f32.mrf.mxu1 }
  0xd3   :  { %v1885_v1 = vpack.c.bf16 %v121_v42, %v118_v40 }
  0xd4   :  { %v1388_v43 = vpop.f32.mrf.mxu0  ;;  %v1404_v4 = vpop.f32.mrf.mxu1 }
  0xd6   :  { %v134_v44 = vpop.f32.mrf.mxu0  ;;  %v256_v5 = vpop.f32.mrf.mxu1 }
  0xd8   :  { %v1389_v45 = vpop.f32.mrf.mxu0  ;;  %v1405_v6 = vpop.f32.mrf.mxu1 }
  0xd9   :  { %v1870_v59 = vpack.c.bf16 %v1389_v45, %v1388_v43 }
  0xda   :  { %v137_v46 = vpop.f32.mrf.mxu0 }
  0xdb   :  { %v1874_v61 = vpack.c.bf16 %v137_v46, %v134_v44 }
  0xdc   :  { %v1392_v47 = vpop.f32.mrf.mxu0 }
  0xde   :  { %v150_v48 = vpop.f32.mrf.mxu0 }
  0xe0   :  { %v1393_v49 = vpop.f32.mrf.mxu0 }
  0xe1   :  { %v1862_v57 = vpack.c.bf16 %v1393_v49, %v1392_v47 }
  0xe2   :  { %v153_v50 = vpop.f32.mrf.mxu0 }
  0xe3   :  { %v1866_v58 = vpack.c.bf16 %v153_v50, %v150_v48 }
  0xe4   :  { %v1396_v51 = vpop.f32.mrf.mxu0 }
  0xe6   :  { %v166_v52 = vpop.f32.mrf.mxu0 }
  0xe8   :  { %v1397_v53 = vpop.f32.mrf.mxu0 }
  0xe9   :  { %v1854_v54 = vpack.c.bf16 %v1397_v53, %v1396_v51 }
  0xea   :  { %v169_v55 = vpop.f32.mrf.mxu0 }
  0xeb   :  { %1407 = vmatpush3.bf16.msra.mxu0 %v1854_v54  ;;  %v1858_v56 = vpack.c.bf16 %v169_v55, %v166_v52 }
  0xec   :  { %1408 = vmatprep.subr.bf16.mxu0 %v1690_v32 }
  0xef   :  { %1409 = vmatpush3.bf16.msra.mxu0 %v1858_v56 }
  0xf0   :  { %1410 = vmatprep.subr.bf16.mxu0 %v1690_v32 }
  0xf3   :  { %1411 = vmatpush3.bf16.msra.mxu0 %v1862_v57 }
  0xf4   :  { %1412 = vmatprep.subr.bf16.mxu0 %v1690_v32 }
  0xf7   :  { %1413 = vmatpush3.bf16.msra.mxu0 %v1866_v58 }
  0xf8   :  { %1414 = vmatprep.subr.bf16.mxu0 %v1690_v32 }
  0xfb   :  { %1415 = vmatpush3.bf16.msra.mxu0 %v1870_v59 }
  0xfc   :  { %1416 = vmatprep.subr.bf16.mxu0 %v1690_v32 }
  0xff   :  { %1417 = vmatpush3.bf16.msra.mxu0 %v1874_v61 }
 0x100   :  { %1418 = vmatprep.subr.bf16.mxu0 %v1690_v32 }
 0x103   :  { %1419 = vmatpush3.bf16.msra.mxu0 %v1880_v63 }
 0x104   :  { %1420 = vmatprep.subr.bf16.mxu0 %v1690_v32 }
 0x107   :  { %1421 = vmatpush3.bf16.msra.mxu0 %v1885_v1 }
 0x108   :  { %1454 = vmatprep.subr.bf16.mxu0 %v1690_v32 }
 0x10a   :  { %1423 = vmatmul.mubr.msk.bf16.vlgmr.msra.gmra.mxu0 %vm1242_vm3, %v1692_v2 }
 0x10b   :  { %1455 = vmatpush3.bf16.msra.mxu0 %v1830_v35  ;;  %1458 = vmatprep.mubr.msk.bf16.mxu0 %vm1691_vm1, %v1690_v32 }
 0x10c   :  { %1456 = vmatprep.subr.bf16.mxu0 %v1690_v32 }
 0x10f   :  { %1457 = vmatpush3.bf16.msra.mxu0 %v1840_v38 }
 0x110   :  { %1462 = vmatprep.subr.bf16.mxu0 %v1690_v32 }
 0x1ca   :  { %v293_v8 = vpop.f32.mrf.mxu0 }
 0x1cb   :  { %v294_v9 = vadd.f32 %v293_v8, %v253_v3 }
 0x1cc   :  { %v1424_v12 = vpop.f32.mrf.mxu0 }
 0x1cd   :  { %v299_v13 = vadd.f32 %v1901_v7, %v294_v9 }
 0x1ce   :  { %v296_v15 = vpop.f32.mrf.mxu0 }
 0x1cf   :  { %v300_v16 = vmul.f32 %v299_v13, %v1903_v11 }
 0x1d0   :  { %v1425_v17 = vpop.f32.mrf.mxu0 }
 0x1d1   :  { %1657 = vtanh.f32 %v300_v16 }
 0x1de   :  { %v1658_v18 = vpop.eup %1657 }
 0x1df   :  { %v302_v20 = vmul.f32 %v1658_v18, %v1903_v11 }
 0x1e1   :  { %v303_v21 = vadd.f32 %v302_v20, %v1907_v19 }
 0x1e3   :  { %306 = vrot.lane.b32.xlu0 %v303_v21, %s1694_s4  ;;  %v304_v24 = vmul.f32 0.0, %v303_v21 }
 0x255   :  { %v307_v22 = vpop.permute.xlu0 %306 }
 0x256   :  { %v309_v23 = vmul.f32 %v307_v22, %v303_v21 }
 0x258   :  { %311 = vrot.lane.b32.xlu1 %v309_v23, %s1695_s30 }
 0x2ca   :  { %v312_v25 = vpop.permute.xlu1 %311 }
 0x2cb   :  { %v314_v26 = vadd.f32 %v312_v25, %v304_v24 }
 0x2cd   :  { %1659 = vtanh.f32 %v314_v26 }
 0x2da   :  { %v1660_v28 = vpop.eup %1659 }
 0x2db   :  { %317 = vrot.lane.b32.xlu1 %v1660_v28, %s1694_s4 }
 0x2df   :  { %322 = vperm.xlu1 %1650, %v1782_v14  }
 0x34d   :  { %v318_v29 = vpop.permute.xlu1 %317 }
 0x34e   :  { %v320_v30 = vmul.f32 %v318_v29, %v303_v21 }
 0x350   :  { %v327_v31 = vpack.c.bf16 %v320_v30, %v320_v30 }
 0x352   :  { %329 = vrot.lane.b32.xlu0 %v327_v31, %s1695_s30 }
 0x35a   :  { %v323_v34 = vpop.permute.xlu1 %322 }
 0x35b   :  { %vm324_vm7 = vcmp.eq.s32.totalorder %v1878_v62, %v323_v34 }
 0x35c   :  { %vm1245_vm8 = vmpackc.low %vm324_vm7, %vm324_vm7 }
 0x3c4   :  { %v330_v33 = vpop.permute.xlu0 %329 }
 0x3c5   :  { %1431 = vmatmul.mubr.msk.bf16.vlgmr.msra.gmra.mxu1 %vm59_vm0, %v330_v33  ;;  %v1698_v33 = vmov 3  }
 0x3c6   :  { %1435 = vmatpush3.bf16.msra.mxu1 %v1854_v54  ;;  %1450 = vmatprep.mubr.msk.bf16.mxu1 %vm1691_vm1, %v1690_v32 }
 0x3c7   :  { %1436 = vmatprep.subr.bf16.mxu1 %v1690_v32 }
 0x3ca   :  { %1437 = vmatpush3.bf16.msra.mxu1 %v1858_v56 }
 0x3cb   :  { %1438 = vmatprep.subr.bf16.mxu1 %v1690_v32 }
 0x3ce   :  { %1439 = vmatpush3.bf16.msra.mxu1 %v1862_v57 }
 0x3cf   :  { %1440 = vmatprep.subr.bf16.mxu1 %v1690_v32 }
 0x3d2   :  { %1441 = vmatpush3.bf16.msra.mxu1 %v1866_v58 }
 0x3d3   :  { %1442 = vmatprep.subr.bf16.mxu1 %v1690_v32 }
 0x3d6   :  { %1443 = vmatpush3.bf16.msra.mxu1 %v1870_v59 }
 0x3d7   :  { %1444 = vmatprep.subr.bf16.mxu1 %v1690_v32 }
 0x3da   :  { %1445 = vmatpush3.bf16.msra.mxu1 %v1874_v61 }
 0x3db   :  { %1446 = vmatprep.subr.bf16.mxu1 %v1690_v32 }
 0x3de   :  { %1447 = vmatpush3.bf16.msra.mxu1 %v1880_v63 }
 0x3df   :  { %1448 = vmatprep.subr.bf16.mxu1 %v1690_v32 }
 0x3e2   :  { %1449 = vmatpush3.bf16.msra.mxu1 %v1885_v1 }
 0x3e3   :  { %1482 = vmatprep.subr.bf16.mxu1 %v1690_v32 }
 0x3e5   :  { %1451 = vmatmul.mubr.msk.bf16.vlgmr.msra.gmra.mxu1 %vm1245_vm8, %v1692_v2 }
 0x3e6   :  { %1483 = vmatpush3.bf16.msra.mxu1 %v1830_v35  ;;  %1486 = vmatprep.mubr.msk.bf16.mxu1 %vm1691_vm1, %v1690_v32 }
 0x3e7   :  { %1484 = vmatprep.subr.bf16.mxu1 %v1690_v32 }
 0x3ea   :  { %1485 = vmatpush3.bf16.msra.mxu1 %v1840_v38 }
 0x3eb   :  { %1490 = vmatprep.subr.bf16.mxu1 %v1690_v32 }
 0x485   :  { %v368_v36 = vpop.f32.mrf.mxu1 }
 0x487   :  { %v1432_v37 = vpop.f32.mrf.mxu1 }
 0x489   :  { %v371_v39 = vpop.f32.mrf.mxu1 }
 0x48b   :  { %v1433_v40 = vpop.f32.mrf.mxu1 }
 0x4a5   :  { %v408_v41 = vpop.f32.mrf.mxu1 }
 0x4a6   :  { %v409_v42 = vadd.f32 %v408_v41, %v368_v36 }
 0x4a7   :  { %v1452_v43 = vpop.f32.mrf.mxu1 }
 0x4a8   :  { %v414_v44 = vadd.f32 %v1901_v7, %v409_v42 }
 0x4a9   :  { %v411_v45 = vpop.f32.mrf.mxu1 }
 0x4aa   :  { %v415_v46 = vmul.f32 %v414_v44, %v1903_v11 }
 0x4ab   :  { %v1453_v47 = vpop.f32.mrf.mxu1 }
 0x4ac   :  { %1661 = vtanh.f32 %v415_v46 }
 0x4b9   :  { %v1662_v48 = vpop.eup %1661 }
 0x4ba   :  { %v417_v49 = vmul.f32 %v1662_v48, %v1903_v11 }
 0x4bc   :  { %v418_v50 = vadd.f32 %v417_v49, %v1907_v19 }
 0x4be   :  { %421 = vrot.lane.b32.xlu0 %v418_v50, %s1694_s4  ;;  %v419_v53 = vmul.f32 %v418_v50, %v314_v26 }
 0x530   :  { %v422_v51 = vpop.permute.xlu0 %421 }
 0x531   :  { %v424_v52 = vmul.f32 %v422_v51, %v418_v50 }
 0x533   :  { %426 = vrot.lane.b32.xlu1 %v424_v52, %s1695_s30 }
 0x5a5   :  { %v427_v55 = vpop.permute.xlu1 %426 }
 0x5a6   :  { %v429_v60 = vadd.f32 %v427_v55, %v419_v53 }
 0x5a8   :  { %1663 = vtanh.f32 %v429_v60 }
 0x5b5   :  { %v1664_v3 = vpop.eup %1663 }
 0x5b6   :  { %432 = vrot.lane.b32.xlu0 %v1664_v3, %s1694_s4 }
 0x5ba   :  { %437 = vperm.xlu0 %1651, %v1782_v14  }
 0x5be   :  { %1652 = vset.pattern.permute.xlu0 %v1698_v33 }
 0x628   :  { %v433_v4 = vpop.permute.xlu0 %432 }
 0x629   :  { %v435_v5 = vmul.f32 %v433_v4, %v418_v50 }
 0x62b   :  { %v442_v6 = vpack.c.bf16 %v435_v5, %v435_v5 }
 0x62d   :  { %444 = vrot.lane.b32.xlu1 %v442_v6, %s1695_s30 }
 0x635   :  { %v438_v9 = vpop.permute.xlu0 %437 }
 0x636   :  { %vm439_vm9 = vcmp.eq.s32.totalorder %v1878_v62, %v438_v9 }
 0x637   :  { %vm1248_vm10 = vmpackc.low %vm439_vm9, %vm439_vm9 }
 0x69f   :  { %v445_v8 = vpop.permute.xlu1 %444 }
 0x6a0   :  { %1459 = vmatmul.mubr.msk.bf16.vlgmr.msra.gmra.mxu0 %vm59_vm0, %v445_v8  ;;  %v1699_v8 = vmov 4  }
 0x6a1   :  { %1463 = vmatpush3.bf16.msra.mxu0 %v1854_v54  ;;  %1478 = vmatprep.mubr.msk.bf16.mxu0 %vm1691_vm1, %v1690_v32 }
 0x6a2   :  { %1464 = vmatprep.subr.bf16.mxu0 %v1690_v32 }
 0x6a5   :  { %1465 = vmatpush3.bf16.msra.mxu0 %v1858_v56 }
 0x6a6   :  { %1466 = vmatprep.subr.bf16.mxu0 %v1690_v32 }
 0x6a9   :  { %1467 = vmatpush3.bf16.msra.mxu0 %v1862_v57 }
 0x6aa   :  { %1468 = vmatprep.subr.bf16.mxu0 %v1690_v32 }
 0x6ad   :  { %1469 = vmatpush3.bf16.msra.mxu0 %v1866_v58 }
 0x6ae   :  { %1470 = vmatprep.subr.bf16.mxu0 %v1690_v32 }
 0x6b1   :  { %1471 = vmatpush3.bf16.msra.mxu0 %v1870_v59 }
 0x6b2   :  { %1472 = vmatprep.subr.bf16.mxu0 %v1690_v32 }
 0x6b5   :  { %1473 = vmatpush3.bf16.msra.mxu0 %v1874_v61 }
 0x6b6   :  { %1474 = vmatprep.subr.bf16.mxu0 %v1690_v32 }
 0x6b9   :  { %1475 = vmatpush3.bf16.msra.mxu0 %v1880_v63 }
 0x6ba   :  { %1476 = vmatprep.subr.bf16.mxu0 %v1690_v32 }
 0x6bd   :  { %1477 = vmatpush3.bf16.msra.mxu0 %v1885_v1 }
 0x6be   :  { %1510 = vmatprep.subr.bf16.mxu0 %v1690_v32 }
 0x6c0   :  { %1479 = vmatmul.mubr.msk.bf16.vlgmr.msra.gmra.mxu0 %vm1248_vm10, %v1692_v2 }
 0x6c1   :  { %1511 = vmatpush3.bf16.msra.mxu0 %v1830_v35  ;;  %1514 = vmatprep.mubr.msk.bf16.mxu0 %vm1691_vm1, %v1690_v32 }
 0x6c2   :  { %1512 = vmatprep.subr.bf16.mxu0 %v1690_v32 }
 0x6c5   :  { %1513 = vmatpush3.bf16.msra.mxu0 %v1840_v38 }
 0x6c6   :  { %1518 = vmatprep.subr.bf16.mxu0 %v1690_v32 }
 0x760   :  { %v483_v10 = vpop.f32.mrf.mxu0 }
 0x762   :  { %v1460_v12 = vpop.f32.mrf.mxu0 }
 0x764   :  { %v486_v13 = vpop.f32.mrf.mxu0 }
 0x766   :  { %v1461_v15 = vpop.f32.mrf.mxu0 }
 0x780   :  { %v523_v16 = vpop.f32.mrf.mxu0 }
 0x781   :  { %v524_v17 = vadd.f32 %v523_v16, %v483_v10 }
 0x782   :  { %v1480_v18 = vpop.f32.mrf.mxu0 }
 0x783   :  { %v529_v20 = vadd.f32 %v1901_v7, %v524_v17 }
 0x784   :  { %v526_v21 = vpop.f32.mrf.mxu0 }
 0x785   :  { %v530_v22 = vmul.f32 %v529_v20, %v1903_v11 }
 0x786   :  { %v1481_v23 = vpop.f32.mrf.mxu0 }
 0x787   :  { %1665 = vtanh.f32 %v530_v22 }
 0x794   :  { %v1666_v24 = vpop.eup %1665 }
 0x795   :  { %v532_v25 = vmul.f32 %v1666_v24, %v1903_v11 }
 0x797   :  { %v533_v26 = vadd.f32 %v532_v25, %v1907_v19 }
 0x799   :  { %536 = vrot.lane.b32.xlu1 %v533_v26, %s1694_s4  ;;  %v534_v29 = vmul.f32 %v533_v26, %v429_v60 }
 0x80b   :  { %v537_v27 = vpop.permute.xlu1 %536 }
 0x80c   :  { %v539_v28 = vmul.f32 %v537_v27, %v533_v26 }
 0x80e   :  { %541 = vrot.lane.b32.xlu1 %v539_v28, %s1695_s30 }
 0x880   :  { %v542_v30 = vpop.permute.xlu1 %541 }
 0x881   :  { %v544_v31 = vadd.f32 %v542_v30, %v534_v29 }
 0x883   :  { %1667 = vtanh.f32 %v544_v31 }
 0x890   :  { %v1668_v34 = vpop.eup %1667 }
 0x891   :  { %547 = vrot.lane.b32.xlu0 %v1668_v34, %s1694_s4 }
 0x895   :  { %552 = vperm.xlu0 %1652, %v1782_v14  }
 0x899   :  { %1653 = vset.pattern.permute.xlu0 %v1699_v8 }
 0x903   :  { %v548_v36 = vpop.permute.xlu0 %547 }
 0x904   :  { %v550_v37 = vmul.f32 %v548_v36, %v533_v26 }
 0x906   :  { %v557_v39 = vpack.c.bf16 %v550_v37, %v550_v37 }
 0x908   :  { %559 = vrot.lane.b32.xlu1 %v557_v39, %s1695_s30 }
 0x910   :  { %v553_v41 = vpop.permute.xlu0 %552 }
 0x911   :  { %vm554_vm11 = vcmp.eq.s32.totalorder %v1878_v62, %v553_v41 }
 0x912   :  { %vm1251_vm12 = vmpackc.low %vm554_vm11, %vm554_vm11 }
 0x97a   :  { %v560_v40 = vpop.permute.xlu1 %559 }
 0x97b   :  { %1487 = vmatmul.mubr.msk.bf16.vlgmr.msra.gmra.mxu1 %vm59_vm0, %v560_v40  ;;  %v1700_v40 = vmov 5  }
 0x97c   :  { %1491 = vmatpush3.bf16.msra.mxu1 %v1854_v54  ;;  %1506 = vmatprep.mubr.msk.bf16.mxu1 %vm1691_vm1, %v1690_v32 }
 0x97d   :  { %1492 = vmatprep.subr.bf16.mxu1 %v1690_v32 }
 0x980   :  { %1493 = vmatpush3.bf16.msra.mxu1 %v1858_v56 }
 0x981   :  { %1494 = vmatprep.subr.bf16.mxu1 %v1690_v32 }
 0x984   :  { %1495 = vmatpush3.bf16.msra.mxu1 %v1862_v57 }
 0x985   :  { %1496 = vmatprep.subr.bf16.mxu1 %v1690_v32 }
 0x988   :  { %1497 = vmatpush3.bf16.msra.mxu1 %v1866_v58 }
 0x989   :  { %1498 = vmatprep.subr.bf16.mxu1 %v1690_v32 }
 0x98c   :  { %1499 = vmatpush3.bf16.msra.mxu1 %v1870_v59 }
 0x98d   :  { %1500 = vmatprep.subr.bf16.mxu1 %v1690_v32 }
 0x990   :  { %1501 = vmatpush3.bf16.msra.mxu1 %v1874_v61 }
 0x991   :  { %1502 = vmatprep.subr.bf16.mxu1 %v1690_v32 }
 0x994   :  { %1503 = vmatpush3.bf16.msra.mxu1 %v1880_v63 }
 0x995   :  { %1504 = vmatprep.subr.bf16.mxu1 %v1690_v32 }
 0x998   :  { %1505 = vmatpush3.bf16.msra.mxu1 %v1885_v1 }
 0x999   :  { %1538 = vmatprep.subr.bf16.mxu1 %v1690_v32 }
 0x99b   :  { %1507 = vmatmul.mubr.msk.bf16.vlgmr.msra.gmra.mxu1 %vm1251_vm12, %v1692_v2 }
 0x99c   :  { %1539 = vmatpush3.bf16.msra.mxu1 %v1830_v35  ;;  %1542 = vmatprep.mubr.msk.bf16.mxu1 %vm1691_vm1, %v1690_v32 }
 0x99d   :  { %1540 = vmatprep.subr.bf16.mxu1 %v1690_v32 }
 0x9a0   :  { %1541 = vmatpush3.bf16.msra.mxu1 %v1840_v38 }
 0x9a1   :  { %1546 = vmatprep.subr.bf16.mxu1 %v1690_v32 }
 0xa3b   :  { %v598_v42 = vpop.f32.mrf.mxu1 }
 0xa3d   :  { %v1488_v43 = vpop.f32.mrf.mxu1 }
 0xa3f   :  { %v601_v44 = vpop.f32.mrf.mxu1 }
 0xa41   :  { %v1489_v45 = vpop.f32.mrf.mxu1 }
 0xa5b   :  { %v638_v46 = vpop.f32.mrf.mxu1 }
 0xa5c   :  { %v639_v47 = vadd.f32 %v638_v46, %v598_v42 }
 0xa5d   :  { %v1508_v48 = vpop.f32.mrf.mxu1 }
 0xa5e   :  { %v644_v49 = vadd.f32 %v1901_v7, %v639_v47 }
 0xa5f   :  { %v641_v50 = vpop.f32.mrf.mxu1 }
 0xa60   :  { %v645_v51 = vmul.f32 %v644_v49, %v1903_v11 }
 0xa61   :  { %v1509_v52 = vpop.f32.mrf.mxu1 }
 0xa62   :  { %1669 = vtanh.f32 %v645_v51 }
 0xa6f   :  { %v1670_v53 = vpop.eup %1669 }
 0xa70   :  { %v647_v55 = vmul.f32 %v1670_v53, %v1903_v11 }
 0xa72   :  { %v648_v60 = vadd.f32 %v647_v55, %v1907_v19 }
 0xa74   :  { %651 = vrot.lane.b32.xlu1 %v648_v60, %s1694_s4  ;;  %v649_v4 = vmul.f32 %v648_v60, %v544_v31 }
 0xae6   :  { %v652_v0 = vpop.permute.xlu1 %651 }
 0xae7   :  { %v654_v3 = vmul.f32 %v652_v0, %v648_v60 }
 0xae9   :  { %656 = vrot.lane.b32.xlu1 %v654_v3, %s1695_s30 }
 0xb5b   :  { %v657_v5 = vpop.permute.xlu1 %656 }
 0xb5c   :  { %v659_v6 = vadd.f32 %v657_v5, %v649_v4 }
 0xb5e   :  { %1671 = vtanh.f32 %v659_v6 }
 0xb6b   :  { %v1672_v9 = vpop.eup %1671 }
 0xb6c   :  { %662 = vrot.lane.b32.xlu0 %v1672_v9, %s1694_s4 }
 0xb70   :  { %667 = vperm.xlu0 %1653, %v1782_v14  }
 0xb74   :  { %1654 = vset.pattern.permute.xlu0 %v1700_v40 }
 0xbde   :  { %v663_v10 = vpop.permute.xlu0 %662 }
 0xbdf   :  { %v665_v12 = vmul.f32 %v663_v10, %v648_v60 }
 0xbe1   :  { %v672_v13 = vpack.c.bf16 %v665_v12, %v665_v12  ;;  %v1701_v12 = vmov 6  }
 0xbe3   :  { %674 = vrot.lane.b32.xlu1 %v672_v13, %s1695_s30 }
 0xbeb   :  { %v668_v16 = vpop.permute.xlu0 %667 }
 0xbec   :  { %vm669_vm13 = vcmp.eq.s32.totalorder %v1878_v62, %v668_v16 }
 0xbed   :  { %vm1254_vm14 = vmpackc.low %vm669_vm13, %vm669_vm13 }
 0xc55   :  { %v675_v15 = vpop.permute.xlu1 %674 }
 0xc56   :  { %1515 = vmatmul.mubr.msk.bf16.vlgmr.msra.gmra.mxu0 %vm59_vm0, %v675_v15 }
 0xc57   :  { %1519 = vmatpush3.bf16.msra.mxu0 %v1854_v54  ;;  %1534 = vmatprep.mubr.msk.bf16.mxu0 %vm1691_vm1, %v1690_v32 }
 0xc58   :  { %1520 = vmatprep.subr.bf16.mxu0 %v1690_v32 }
 0xc5b   :  { %1521 = vmatpush3.bf16.msra.mxu0 %v1858_v56 }
 0xc5c   :  { %1522 = vmatprep.subr.bf16.mxu0 %v1690_v32 }
 0xc5f   :  { %1523 = vmatpush3.bf16.msra.mxu0 %v1862_v57 }
 0xc60   :  { %1524 = vmatprep.subr.bf16.mxu0 %v1690_v32 }
 0xc63   :  { %1525 = vmatpush3.bf16.msra.mxu0 %v1866_v58 }
 0xc64   :  { %1526 = vmatprep.subr.bf16.mxu0 %v1690_v32 }
 0xc67   :  { %1527 = vmatpush3.bf16.msra.mxu0 %v1870_v59 }
 0xc68   :  { %1528 = vmatprep.subr.bf16.mxu0 %v1690_v32 }
 0xc6b   :  { %1529 = vmatpush3.bf16.msra.mxu0 %v1874_v61 }
 0xc6c   :  { %1530 = vmatprep.subr.bf16.mxu0 %v1690_v32 }
 0xc6f   :  { %1531 = vmatpush3.bf16.msra.mxu0 %v1880_v63 }
 0xc70   :  { %1532 = vmatprep.subr.bf16.mxu0 %v1690_v32 }
 0xc73   :  { %1533 = vmatpush3.bf16.msra.mxu0 %v1885_v1 }
 0xc74   :  { %1566 = vmatprep.subr.bf16.mxu0 %v1690_v32 }
 0xc76   :  { %1535 = vmatmul.mubr.msk.bf16.vlgmr.msra.gmra.mxu0 %vm1254_vm14, %v1692_v2 }
 0xc77   :  { %1567 = vmatpush3.bf16.msra.mxu0 %v1830_v35  ;;  %1570 = vmatprep.mubr.msk.bf16.mxu0 %vm1691_vm1, %v1690_v32 }
 0xc78   :  { %1568 = vmatprep.subr.bf16.mxu0 %v1690_v32 }
 0xc7b   :  { %1569 = vmatpush3.bf16.msra.mxu0 %v1840_v38 }
 0xc7c   :  { %1574 = vmatprep.subr.bf16.mxu0 %v1690_v32 }
 0xd16   :  { %v713_v17 = vpop.f32.mrf.mxu0 }
 0xd18   :  { %v1516_v18 = vpop.f32.mrf.mxu0 }
 0xd1a   :  { %v716_v20 = vpop.f32.mrf.mxu0 }
 0xd1c   :  { %v1517_v21 = vpop.f32.mrf.mxu0 }
 0xd36   :  { %v753_v22 = vpop.f32.mrf.mxu0 }
 0xd37   :  { %v754_v23 = vadd.f32 %v753_v22, %v713_v17 }
 0xd38   :  { %v1536_v24 = vpop.f32.mrf.mxu0 }
 0xd39   :  { %v759_v25 = vadd.f32 %v1901_v7, %v754_v23 }
 0xd3a   :  { %v756_v26 = vpop.f32.mrf.mxu0 }
 0xd3b   :  { %v760_v27 = vmul.f32 %v759_v25, %v1903_v11 }
 0xd3c   :  { %v1537_v28 = vpop.f32.mrf.mxu0 }
 0xd3d   :  { %1673 = vtanh.f32 %v760_v27 }
 0xd4a   :  { %v1674_v29 = vpop.eup %1673 }
 0xd4b   :  { %v762_v30 = vmul.f32 %v1674_v29, %v1903_v11 }
 0xd4d   :  { %v763_v31 = vadd.f32 %v762_v30, %v1907_v19 }
 0xd4f   :  { %766 = vrot.lane.b32.xlu1 %v763_v31, %s1694_s4  ;;  %v764_v36 = vmul.f32 %v763_v31, %v659_v6 }
 0xdc1   :  { %v767_v33 = vpop.permute.xlu1 %766 }
 0xdc2   :  { %v769_v34 = vmul.f32 %v767_v33, %v763_v31 }
 0xdc4   :  { %771 = vrot.lane.b32.xlu1 %v769_v34, %s1695_s30 }
 0xe36   :  { %v772_v37 = vpop.permute.xlu1 %771 }
 0xe37   :  { %v774_v39 = vadd.f32 %v772_v37, %v764_v36 }
 0xe39   :  { %1675 = vtanh.f32 %v774_v39 }
 0xe46   :  { %v1676_v41 = vpop.eup %1675 }
 0xe47   :  { %777 = vrot.lane.b32.xlu0 %v1676_v41, %s1694_s4 }
 0xe4b   :  { %782 = vperm.xlu0 %1654, %v1782_v14  }
 0xe4f   :  { %1655 = vset.pattern.permute.xlu0 %v1701_v12 }
 0xeb9   :  { %v778_v42 = vpop.permute.xlu0 %777 }
 0xeba   :  { %v780_v43 = vmul.f32 %v778_v42, %v763_v31 }
 0xebc   :  { %v787_v44 = vpack.c.bf16 %v780_v43, %v780_v43  ;;  %v1702_v43 = vmov 7  }
 0xebe   :  { %789 = vrot.lane.b32.xlu1 %v787_v44, %s1695_s30 }
 0xec6   :  { %v783_v46 = vpop.permute.xlu0 %782 }
 0xec7   :  { %vm784_vm15 = vcmp.eq.s32.totalorder %v1878_v62, %v783_v46 }
 0xec8   :  { %vm1257_vm2 = vmpackc.low %vm784_vm15, %vm784_vm15 }
 0xf30   :  { %v790_v45 = vpop.permute.xlu1 %789 }
 0xf31   :  { %1543 = vmatmul.mubr.msk.bf16.vlgmr.msra.gmra.mxu1 %vm59_vm0, %v790_v45 }
 0xf32   :  { %1547 = vmatpush3.bf16.msra.mxu1 %v1854_v54  ;;  %1562 = vmatprep.mubr.msk.bf16.mxu1 %vm1691_vm1, %v1690_v32 }
 0xf33   :  { %1548 = vmatprep.subr.bf16.mxu1 %v1690_v32 }
 0xf36   :  { %1549 = vmatpush3.bf16.msra.mxu1 %v1858_v56 }
 0xf37   :  { %1550 = vmatprep.subr.bf16.mxu1 %v1690_v32 }
 0xf3a   :  { %1551 = vmatpush3.bf16.msra.mxu1 %v1862_v57 }
 0xf3b   :  { %1552 = vmatprep.subr.bf16.mxu1 %v1690_v32 }
 0xf3e   :  { %1553 = vmatpush3.bf16.msra.mxu1 %v1866_v58 }
 0xf3f   :  { %1554 = vmatprep.subr.bf16.mxu1 %v1690_v32 }
 0xf42   :  { %1555 = vmatpush3.bf16.msra.mxu1 %v1870_v59 }
 0xf43   :  { %1556 = vmatprep.subr.bf16.mxu1 %v1690_v32 }
 0xf46   :  { %1557 = vmatpush3.bf16.msra.mxu1 %v1874_v61 }
 0xf47   :  { %1558 = vmatprep.subr.bf16.mxu1 %v1690_v32 }
 0xf4a   :  { %1559 = vmatpush3.bf16.msra.mxu1 %v1880_v63 }
 0xf4b   :  { %1560 = vmatprep.subr.bf16.mxu1 %v1690_v32 }
 0xf4e   :  { %1561 = vmatpush3.bf16.msra.mxu1 %v1885_v1 }
 0xf4f   :  { %1594 = vmatprep.subr.bf16.mxu1 %v1690_v32 }
 0xf51   :  { %1563 = vmatmul.mubr.msk.bf16.vlgmr.msra.gmra.mxu1 %vm1257_vm2, %v1692_v2 }
 0xf52   :  { %1595 = vmatpush3.bf16.msra.mxu1 %v1830_v35  ;;  %1598 = vmatprep.mubr.msk.bf16.mxu1 %vm1691_vm1, %v1690_v32 }
 0xf53   :  { %1596 = vmatprep.subr.bf16.mxu1 %v1690_v32 }
 0xf56   :  { %1597 = vmatpush3.bf16.msra.mxu1 %v1840_v38 }
 0xf57   :  { %1602 = vmatprep.subr.bf16.mxu1 %v1690_v32 }
 0xff1   :  { %v828_v47 = vpop.f32.mrf.mxu1 }
 0xff3   :  { %v1544_v48 = vpop.f32.mrf.mxu1 }
 0xff5   :  { %v831_v49 = vpop.f32.mrf.mxu1 }
 0xff7   :  { %v1545_v50 = vpop.f32.mrf.mxu1 }
0x1011   :  { %v868_v51 = vpop.f32.mrf.mxu1 }
0x1012   :  { %v869_v52 = vadd.f32 %v868_v51, %v828_v47 }
0x1013   :  { %v1564_v53 = vpop.f32.mrf.mxu1 }
0x1014   :  { %v874_v55 = vadd.f32 %v1901_v7, %v869_v52 }
0x1015   :  { %v871_v60 = vpop.f32.mrf.mxu1 }
0x1016   :  { %v875_v35 = vmul.f32 %v874_v55, %v1903_v11 }
0x1017   :  { %v1565_v0 = vpop.f32.mrf.mxu1 }
0x1018   :  { %1677 = vtanh.f32 %v875_v35 }
0x1025   :  { %v1678_v3 = vpop.eup %1677 }
0x1026   :  { %v877_v4 = vmul.f32 %v1678_v3, %v1903_v11 }
0x1028   :  { %v878_v38 = vadd.f32 %v877_v4, %v1907_v19  ;;  %v1126_v4 = vld [vmem:[%s2188_s5] sm:$0xff] }
0x102a   :  { %881 = vrot.lane.b32.xlu1 %v878_v38, %s1694_s4  ;;  %v879_v8 = vmul.f32 %v878_v38, %v774_v39 }
0x109c   :  { %v882_v5 = vpop.permute.xlu1 %881 }
0x109d   :  { %v884_v6 = vmul.f32 %v882_v5, %v878_v38 }
0x109f   :  { %886 = vrot.lane.b32.xlu1 %v884_v6, %s1695_s30 }
0x1111   :  { %v887_v9 = vpop.permute.xlu1 %886 }
0x1112   :  { %v889_v10 = vadd.f32 %v887_v9, %v879_v8  ;;  %v1265_v9 = vld [vmem:[%s2189_s6] ss:$0 sm:$0xff] }
0x1114   :  { %1679 = vtanh.f32 %v889_v10 }
0x1121   :  { %v1680_v13 = vpop.eup %1679 }
0x1122   :  { %892 = vrot.lane.b32.xlu0 %v1680_v13, %s1694_s4 }
0x1126   :  { %897 = vperm.xlu0 %1655, %v1782_v14  }
0x112a   :  { %1656 = vset.pattern.permute.xlu0 %v1702_v43 }
0x1194   :  { %v893_v15 = vpop.permute.xlu0 %892 }
0x1195   :  { %v895_v16 = vmul.f32 %v893_v15, %v878_v38  ;;  %v1218_v15 = vcvt.s32.f32 %v1878_v62 }
0x1197   :  { %v902_v17 = vpack.c.bf16 %v895_v16, %v895_v16 }
0x1199   :  { %904 = vrot.lane.b32.xlu1 %v902_v17, %s1695_s30 }
0x11a1   :  { %v898_v20 = vpop.permute.xlu0 %897 }
0x11a2   :  { %vm899_vm3 = vcmp.eq.s32.totalorder %v1878_v62, %v898_v20 }
0x11a3   :  { %vm1260_vm4 = vmpackc.low %vm899_vm3, %vm899_vm3 }
0x120b   :  { %v905_v18 = vpop.permute.xlu1 %904 }
0x120c   :  { %1571 = vmatmul.mubr.msk.bf16.vlgmr.msra.gmra.mxu0 %vm59_vm0, %v905_v18 }
0x120d   :  { %1575 = vmatpush3.bf16.msra.mxu0 %v1854_v54  ;;  %1590 = vmatprep.mubr.msk.bf16.mxu0 %vm1691_vm1, %v1690_v32 }
0x120e   :  { %1576 = vmatprep.subr.bf16.mxu0 %v1690_v32 }
0x1211   :  { %1577 = vmatpush3.bf16.msra.mxu0 %v1858_v56 }
0x1212   :  { %1578 = vmatprep.subr.bf16.mxu0 %v1690_v32 }
0x1215   :  { %1579 = vmatpush3.bf16.msra.mxu0 %v1862_v57 }
0x1216   :  { %1580 = vmatprep.subr.bf16.mxu0 %v1690_v32 }
0x1219   :  { %1581 = vmatpush3.bf16.msra.mxu0 %v1866_v58 }
0x121a   :  { %1582 = vmatprep.subr.bf16.mxu0 %v1690_v32 }
0x121d   :  { %1583 = vmatpush3.bf16.msra.mxu0 %v1870_v59 }
0x121e   :  { %1584 = vmatprep.subr.bf16.mxu0 %v1690_v32 }
0x1221   :  { %1585 = vmatpush3.bf16.msra.mxu0 %v1874_v61 }
0x1222   :  { %1586 = vmatprep.subr.bf16.mxu0 %v1690_v32 }
0x1225   :  { %1587 = vmatpush3.bf16.msra.mxu0 %v1880_v63 }
0x1226   :  { %1588 = vmatprep.subr.bf16.mxu0 %v1690_v32 }
0x1229   :  { %1589 = vmatpush3.bf16.msra.mxu0 %v1885_v1 }
0x122a   :  { %1622 = vmatprep.subr.mxu0 %v1690_v32 }
0x122c   :  { %1591 = vmatmul.mubr.msk.bf16.vlgmr.msra.gmra.mxu0 %vm1260_vm4, %v1692_v2 }
0x122d   :  { %1630 = vmatprep.mubr.msk.f32.mxu0 %vm1691_vm1, %v1690_v32 }
0x12cc   :  { %v943_v21 = vpop.f32.mrf.mxu0 }
0x12ce   :  { %v1572_v22 = vpop.f32.mrf.mxu0 }
0x12d0   :  { %v946_v23 = vpop.f32.mrf.mxu0 }
0x12d2   :  { %v1573_v24 = vpop.f32.mrf.mxu0 }
0x12ec   :  { %v983_v25 = vpop.f32.mrf.mxu0 }
0x12ed   :  { %v984_v26 = vadd.f32 %v983_v25, %v943_v21 }
0x12ee   :  { %v1592_v27 = vpop.f32.mrf.mxu0 }
0x12ef   :  { %v989_v28 = vadd.f32 %v1901_v7, %v984_v26 }
0x12f0   :  { %v986_v29 = vpop.f32.mrf.mxu0 }
0x12f1   :  { %v990_v30 = vmul.f32 %v989_v28, %v1903_v11 }
0x12f2   :  { %v1593_v31 = vpop.f32.mrf.mxu0 }
0x12f3   :  { %1681 = vtanh.f32 %v990_v30 }
0x1300   :  { %v1682_v33 = vpop.eup %1681 }
0x1301   :  { %v992_v34 = vmul.f32 %v1682_v33, %v1903_v11 }
0x1303   :  { %v993_v36 = vadd.f32 %v992_v34, %v1907_v19 }
0x1305   :  { %996 = vrot.lane.b32.xlu1 %v993_v36, %s1694_s4  ;;  %v994_v40 = vmul.f32 %v993_v36, %v889_v10 }
0x1377   :  { %v997_v37 = vpop.permute.xlu1 %996 }
0x1378   :  { %v999_v39 = vmul.f32 %v997_v37, %v993_v36 }
0x137a   :  { %1001 = vrot.lane.b32.xlu1 %v999_v39, %s1695_s30 }
0x13ec   :  { %v1002_v41 = vpop.permute.xlu1 %1001 }
0x13ed   :  { %v1004_v42 = vadd.f32 %v1002_v41, %v994_v40 }
0x13ef   :  { %1683 = vtanh.f32 %v1004_v42 }
0x13fc   :  { %v1684_v44 = vpop.eup %1683 }
0x13fd   :  { %1007 = vrot.lane.b32.xlu0 %v1684_v44, %s1694_s4 }
0x1401   :  { %1012 = vperm.xlu0 %1656, %v1782_v14  }
0x146f   :  { %v1008_v45 = vpop.permute.xlu0 %1007 }
0x1470   :  { %v1010_v46 = vmul.f32 %v1008_v45, %v993_v36 }
0x1472   :  { %v1017_v47 = vpack.c.bf16 %v1010_v46, %v1010_v46 }
0x1474   :  { %1019 = vrot.lane.b32.xlu1 %v1017_v47, %s1695_s30 }
0x147c   :  { %v1013_v14 = vpop.permute.xlu0 %1012 }
0x14e6   :  { %v1020_v48 = vpop.permute.xlu1 %1019 }
0x14e7   :  { %1599 = vmatmul.mubr.msk.bf16.vlgmr.msra.gmra.mxu1 %vm59_vm0, %v1020_v48 }
0x14e8   :  { %1603 = vmatpush3.bf16.msra.mxu1 %v1854_v54  ;;  %1618 = vmatprep.mubr.msk.bf16.mxu1 %vm1691_vm1, %v1690_v32  ;;  %vm1014_vm1 = vcmp.eq.s32.totalorder %v1878_v62, %v1013_v14 }
0x14e9   :  { %1604 = vmatprep.subr.bf16.mxu1 %v1690_v32  ;;  %vm1263_vm5 = vmpackc.low %vm1014_vm1, %vm1014_vm1 }
0x14ec   :  { %1605 = vmatpush3.bf16.msra.mxu1 %v1858_v56 }
0x14ed   :  { %1606 = vmatprep.subr.bf16.mxu1 %v1690_v32 }
0x14f0   :  { %1607 = vmatpush3.bf16.msra.mxu1 %v1862_v57 }
0x14f1   :  { %1608 = vmatprep.subr.bf16.mxu1 %v1690_v32 }
0x14f4   :  { %1609 = vmatpush3.bf16.msra.mxu1 %v1866_v58 }
0x14f5   :  { %1610 = vmatprep.subr.bf16.mxu1 %v1690_v32 }
0x14f8   :  { %1611 = vmatpush3.bf16.msra.mxu1 %v1870_v59 }
0x14f9   :  { %1612 = vmatprep.subr.bf16.mxu1 %v1690_v32 }
0x14fc   :  { %1613 = vmatpush3.bf16.msra.mxu1 %v1874_v61 }
0x14fd   :  { %1614 = vmatprep.subr.bf16.mxu1 %v1690_v32 }
0x1500   :  { %1615 = vmatpush3.bf16.msra.mxu1 %v1880_v63 }
0x1501   :  { %1616 = vmatprep.subr.bf16.mxu1 %v1690_v32 }
0x1504   :  { %1617 = vmatpush3.bf16.msra.mxu1 %v1885_v1 }
0x1507   :  { %1619 = vmatmul.mubr.msk.bf16.vlgmr.msra.gmra.mxu1 %vm1263_vm5, %v1692_v2 }
0x15a7   :  { %v1058_v54 = vpop.f32.mrf.mxu1 }
0x15a9   :  { %v1600_v56 = vpop.f32.mrf.mxu1 }
0x15ab   :  { %v1061_v57 = vpop.f32.mrf.mxu1 }
0x15ad   :  { %v1601_v58 = vpop.f32.mrf.mxu1 }
0x15c7   :  { %v1098_v59 = vpop.f32.mrf.mxu1 }
0x15c8   :  { %v1099_v61 = vadd.f32 %v1098_v59, %v1058_v54 }
0x15c9   :  { %v1620_v49 = vpop.f32.mrf.mxu1 }
0x15ca   :  { %v1104_v50 = vadd.f32 %v1901_v7, %v1099_v61  ;;  %v1129_v7 = vld [vmem:[%s2188_s5 + $0x18] sm:$0xff] }
0x15cb   :  { %v1101_v51 = vpop.f32.mrf.mxu1  ;;  %1623 = vmatpush3.msra.mxu0 %v1129_v7 }
0x15cc   :  { %v1105_v63 = vmul.f32 %v1104_v50, %v1903_v11  ;;  %1624 = vmatprep.subr.mxu0 %v1690_v32 }
0x15cd   :  { %v1621_v52 = vpop.f32.mrf.mxu1 }
0x15ce   :  { %1685 = vtanh.f32 %v1105_v63 }
0x15db   :  { %v1686_v53 = vpop.eup %1685 }
0x15dc   :  { %v1107_v1 = vmul.f32 %v1686_v53, %v1903_v11  ;;  %v1128_v11 = vld [vmem:[%s2188_s5 + $0x10] sm:$0xff] }
0x15dd   :  { %1625 = vmatpush3.msra.mxu0 %v1128_v11 }
0x15de   :  { %v1108_v55 = vadd.f32 %v1107_v1, %v1907_v19  ;;  %v1127_v19 = vld [vmem:[%s2188_s5 + $0x8] sm:$0xff]  ;;  %1626 = vmatprep.subr.mxu0 %v1690_v32 }
0x15df   :  { %1627 = vmatpush3.msra.mxu0 %v1127_v19 }
0x15e0   :  { %1111 = vrot.lane.b32.xlu1 %v1108_v55, %s1694_s4  ;;  %v1109_v35 = vmul.f32 %v1108_v55, %v1004_v42  ;;  %1628 = vmatprep.subr.mxu0 %v1690_v32 }
0x15e1   :  { %1629 = vmatpush3.msra.mxu0 %v1126_v4 }
0x1652   :  { %v1112_v2 = vpop.permute.xlu1 %1111 }
0x1653   :  { %v1114_v60 = vmul.f32 %v1112_v2, %v1108_v55 }
0x1655   :  { %1116 = vrot.lane.b32.xlu1 %v1114_v60, %s1695_s30 }
0x16c7   :  { %v1117_v0 = vpop.permute.xlu1 %1116 }
0x16c8   :  { %v1119_v3 = vadd.f32 %v1117_v0, %v1109_v35 }
0x16ca   :  { %1687 = vtanh.f32 %v1119_v3 }
0x16d7   :  { %v1688_v38 = vpop.eup %1687 }
0x16d8   :  { %1122 = vrot.lane.b32.xlu0 %v1688_v38, %s1694_s4 }
0x174a   :  { %v1123_v5 = vpop.permute.xlu0 %1122 }
0x174b   :  { %v1125_v6 = vmul.f32 %v1123_v5, %v1108_v55 }
0x174d   :  { %1138 = vrot.lane.b32.xlu1 %v1125_v6, %s1695_s30 }
0x17bf   :  { %v1139_v8 = vpop.permute.xlu1 %1138 }
0x17c0   :  { %1631 = vmatmul.mubr.msk.f32.vlgmr.msra.gmra.mxu0 %vm59_vm0, %v1139_v8  ;;  %vm1223_vm0 = vcmask 7168  }
0x1880   :  { %v1208_v10 = vpop.f32.mrf.mxu0 }
0x1881   :  { %v1209_v12 = vadd.f32 %v1265_v9, %v1208_v10 }
0x1882   :  { %v1632_v32 = vpop.f32.mrf.mxu0 }
0x1883   :  { %v1213_v13 = vsel %vm1212_vm6, %v1209_v12, -inf }
0x1884   :  { %1215 = vmax.xlane.f32.xlu0 %v1213_v13  ;;  %1214 = vst [vmem:[%s2190_s8] sm:$0xff] %v1213_v13 }
0x190d   :  { %v1216_v16 = vpop.xlane.xlu0 %1215 }
0x190e   :  { %vm1217_vm7 = vcmp.eq.f32.partialorder %v1213_v13, %v1216_v16 }
0x190f   :  { %v1219_v17 = vsel %vm1217_vm7, %v1218_v15, 128.0 }
0x1910   :  { %1220 = vmin.xlane.f32.xlu1 %v1219_v17 }
0x1999   :  { %v1221_v18 = vpop.xlane.xlu1 %1220 }
0x199a   :  { %v1633_v20 = vtrunc.f32 %v1221_v18 }
0x199c   :  { %v1634_v21 = vcvt.f32.s32 %v1633_v20 }
0x199e   :  { %1224 = vst.msk [vmem:[%s2191_s7] sm:$0xff] %vm1223_vm0, %v1634_v21 }

</bundles_post_ra>
